<compile_context>
chip_gen: v7x
topology: tpu7x:2x2x1
jax: 0.10.0
libtpu: 0.0.40
codegen_flags: <defaults>
</compile_context>

<pallas_src>
import jax
import jax.numpy as jnp
import numpy as np
from jax.experimental import pallas as pl
from jax.experimental.pallas import tpu as pltpu


def _round_up(x, m):
    return (x + m - 1) // m * m


# ---------------------------------------------------------------------------
# Recurrent kernel: single invocation, time loop inside, emits hidden states.
# ---------------------------------------------------------------------------
def _lstm_kernel(x_ref, wih_ref, whh_ref, b_ref, h_out_ref, h_sc, c_sc):
    """x_ref:   (T, B, E)  bf16   full sequence, resident in VMEM
       wih_ref: (E, 4H)    bf16   input->gates (transposed, gate order i,f,o,g)
       whh_ref: (H, 4H)    bf16   hidden->gates (transposed, i,f,o,g)
       b_ref:   (1, 4H)    f32    b_ih + b_hh (reordered)
       h_out_ref: (B, T-1, H) bf16  hidden states for t = 1..T-1 (batch-major)
       h_sc/c_sc: (B, H)   f32    recurrent state scratch
    """
    T = x_ref.shape[0]
    H = h_sc.shape[1]

    h_sc[...] = jnp.zeros_like(h_sc)
    c_sc[...] = jnp.zeros_like(c_sc)

    def cell(x_t):
        # x_t: (B, E) bf16.  MXU: bf16 x bf16 -> f32 accumulate.
        h_bf = h_sc[...].astype(jnp.bfloat16)
        gates = (jnp.dot(x_t, wih_ref[...], preferred_element_type=jnp.float32)
                 + jnp.dot(h_bf, whh_ref[...],
                           preferred_element_type=jnp.float32)
                 + b_ref[...])                        # (B, 4H) f32
        sig = jax.nn.sigmoid(gates[:, :3 * H])        # i | f | o  (one EUP pass)
        g_g = jnp.tanh(gates[:, 3 * H:])              # g
        c_new = sig[:, H:2 * H] * c_sc[...] + sig[:, :H] * g_g
        h_new = sig[:, 2 * H:] * jnp.tanh(c_new)
        c_sc[...] = c_new
        h_sc[...] = h_new
        return h_new

    # t = 0 consumes the image feature; its logits are discarded by the
    # final [:, 1:, :] slice, so its hidden state is not stored.
    cell(x_ref[0])

    # Static unroll over the (short) caption length: static store indices,
    # full cross-step visibility for the scheduler.
    for t in range(1, T):
        h_new = cell(x_ref[t])
        h_out_ref[:, t - 1, :] = h_new.astype(h_out_ref.dtype)


def lstm_pallas(x_tbe, w_ih_t, w_hh_t, bias):
    """x_tbe: (T, B, E) bf16.  Returns hidden states (B, T-1, H) bf16."""
    T, B, E = x_tbe.shape
    H = w_hh_t.shape[0]

    grid_spec = pltpu.PrefetchScalarGridSpec(
        num_scalar_prefetch=0,
        grid=(1,),  # whole recurrence in one invocation (no per-step DMA/grid cost)
        in_specs=[
            pl.BlockSpec((T, B, E), lambda i: (0, 0, 0)),
            pl.BlockSpec((E, 4 * H), lambda i: (0, 0)),
            pl.BlockSpec((H, 4 * H), lambda i: (0, 0)),
            pl.BlockSpec((1, 4 * H), lambda i: (0, 0)),
        ],
        out_specs=pl.BlockSpec((B, T - 1, H), lambda i: (0, 0, 0)),
        scratch_shapes=[
            pltpu.VMEM((B, H), jnp.float32),   # h
            pltpu.VMEM((B, H), jnp.float32),   # c
        ],
    )
    return pl.pallas_call(
        _lstm_kernel,
        out_shape=jax.ShapeDtypeStruct((B, T - 1, H), jnp.bfloat16),
        grid_spec=grid_spec,
        compiler_params=pltpu.CompilerParams(
            dimension_semantics=("arbitrary",),   # recurrence is sequential
            vmem_limit_bytes=48 * 1024 * 1024),   # safe on v5e/v6e/v7x
    )(x_tbe, w_ih_t, w_hh_t, bias)


# ---------------------------------------------------------------------------
# Hoisted FC kernel: one big (M, H) @ (H, V) matmul + bias, parallel grid.
# ---------------------------------------------------------------------------
def _fc_bias_kernel(h_ref, w_ref, b_ref, o_ref):
    o_ref[...] = (
        jnp.dot(h_ref[...], w_ref[...], preferred_element_type=jnp.float32)
        + b_ref[...]).astype(o_ref.dtype)


def fc_pallas(h2d, w_fc_t, b_fc):
    """h2d: (M, H) bf16, w_fc_t: (H, V) bf16, b_fc: (1, V) f32 -> (M, V) f32."""
    M, H = h2d.shape
    V = w_fc_t.shape[1]

    # Lane-dense V tiling (multiples of 128).
    V_pad = _round_up(V, 128)
    if V_pad != V:
        w_fc_t = jnp.pad(w_fc_t, ((0, 0), (0, V_pad - V)))
        b_fc = jnp.pad(b_fc, ((0, 0), (0, V_pad - V)))
    tn = next(c for c in (512, 256, 128) if V_pad % c == 0)

    # Row tiling: single full-dim block when small, else 256-row MXU tiles.
    if M <= 512:
        tm, M_pad = M, M
    else:
        tm = 256
        M_pad = _round_up(M, tm)
        if M_pad != M:
            h2d = jnp.pad(h2d, ((0, M_pad - M), (0, 0)))

    grid = (M_pad // tm, V_pad // tn)
    out = pl.pallas_call(
        _fc_bias_kernel,
        out_shape=jax.ShapeDtypeStruct((M_pad, V_pad), jnp.float32),
        grid_spec=pltpu.PrefetchScalarGridSpec(
            num_scalar_prefetch=0,
            grid=grid,
            in_specs=[
                pl.BlockSpec((tm, H), lambda i, j: (i, 0)),
                pl.BlockSpec((H, tn), lambda i, j: (0, j)),
                pl.BlockSpec((1, tn), lambda i, j: (0, j)),
            ],
            out_specs=pl.BlockSpec((tm, tn), lambda i, j: (i, j)),
        ),
        compiler_params=pltpu.CompilerParams(
            dimension_semantics=("parallel", "parallel"),  # megacore on v7x
            vmem_limit_bytes=48 * 1024 * 1024),
    )(h2d, w_fc_t, b_fc)
    return out[:M, :V]


# ---------------------------------------------------------------------------
# Module wrapper (parameters in PyTorch layout; kernel layout precomputed).
# ---------------------------------------------------------------------------
class DecoderRNNPallas:

    def __init__(self, n_embd, hidden_size, vocab_size, num_layers=1, seed=0):
        assert num_layers == 1, "kernel implements the single-layer LSTM"
        self.n_embd = n_embd
        self.hidden_size = hidden_size
        self.vocab_size = vocab_size

        key = jax.random.PRNGKey(seed)
        ks = jax.random.split(key, 7)
        H = hidden_size
        k = 1.0 / np.sqrt(H)

        # PyTorch-layout parameters (gate order i, f, g, o).
        self.embedding = jax.random.normal(ks[0], (vocab_size, n_embd),
                                           jnp.float32)
        self.w_ih = jax.random.uniform(ks[1], (4 * H, n_embd), jnp.float32, -k, k)
        self.w_hh = jax.random.uniform(ks[2], (4 * H, H), jnp.float32, -k, k)
        self.b_ih = jax.random.uniform(ks[3], (4 * H,), jnp.float32, -k, k)
        self.b_hh = jax.random.uniform(ks[4], (4 * H,), jnp.float32, -k, k)
        self.w_fc = jax.random.uniform(ks[5], (vocab_size, H), jnp.float32, -k, k)
        self.b_fc = jax.random.uniform(ks[6], (vocab_size,), jnp.float32, -k, k)

        # Kernel layout: transpose, reorder gates (i,f,g,o)->(i,f,o,g), bf16
        # MXU operands, fused f32 bias.
        perm = np.concatenate([np.arange(0, 2 * H),
                               np.arange(3 * H, 4 * H),
                               np.arange(2 * H, 3 * H)])
        self.w_ih_t = self.w_ih[perm].T.astype(jnp.bfloat16)    # (E, 4H)
        self.w_hh_t = self.w_hh[perm].T.astype(jnp.bfloat16)    # (H, 4H)
        self.bias = (self.b_ih + self.b_hh)[perm].reshape(1, 4 * H)  # f32
        self.w_fc_t = self.w_fc.T.astype(jnp.bfloat16)           # (H, V)
        self.b_fc2d = self.b_fc.reshape(1, vocab_size)            # f32

    def forward(self, features, captions):
        # features: (B, n_embd) f32, captions: (B, T) int32 -> (B, T-1, V) f32
        B = features.shape[0]
        captions = captions[:, :-1]                                # (B, T-1)
        # Build the input time-major directly (gather rows per step) instead of
        # materializing (B, T, E) and transposing.
        emb = jnp.take(self.embedding, captions.T, axis=0)         # (T-1, B, E)
        x = jnp.concatenate([features[None, :, :], emb], axis=0)   # (T, B, E)
        x = x.astype(jnp.bfloat16)
        # TODO(synk): for very small B (<8) pad the batch to a sublane multiple
        # to improve MXU row occupancy; skipped here for clarity.

        h = lstm_pallas(x, self.w_ih_t, self.w_hh_t, self.bias)    # (B, T-1, H)
        Tm1 = h.shape[1]
        h2d = h.reshape(B * Tm1, self.hidden_size)                 # free reshape
        logits2d = fc_pallas(h2d, self.w_fc_t, self.b_fc2d)        # (B*(T-1), V)
        return logits2d.reshape(B, Tm1, self.vocab_size)           # batch-first

    # Pure-JAX reference (faithful PyTorch gate order/layout, same bf16
    # matmul-operand precision as the kernel path) for correctness checking.
    def forward_ref(self, features, captions):
        H = self.hidden_size
        captions = captions[:, :-1]
        emb = jnp.take(self.embedding, captions, axis=0)           # (B, T-1, E)
        x = jnp.concatenate([features[:, None, :], emb], axis=1)   # (B, T, E)
        x = x.astype(jnp.bfloat16)

        w_ih_t = self.w_ih.T.astype(jnp.bfloat16)
        w_hh_t = self.w_hh.T.astype(jnp.bfloat16)
        bias = (self.b_ih + self.b_hh)[None, :]
        w_fc_t = self.w_fc.T.astype(jnp.bfloat16)

        def step(carry, x_t):
            h, c = carry
            gates = (jnp.dot(x_t, w_ih_t, preferred_element_type=jnp.float32)
                     + jnp.dot(h.astype(jnp.bfloat16), w_hh_t,
                               preferred_element_type=jnp.float32) + bias)
            i = jax.nn.sigmoid(gates[:, 0 * H:1 * H])
            f = jax.nn.sigmoid(gates[:, 1 * H:2 * H])
            g = jnp.tanh(gates[:, 2 * H:3 * H])
            o = jax.nn.sigmoid(gates[:, 3 * H:4 * H])
            c = f * c + i * g
            h = o * jnp.tanh(c)
            return (h, c), h

        B = x.shape[0]
        h0 = jnp.zeros((B, H), jnp.float32)
        c0 = jnp.zeros((B, H), jnp.float32)
        _, hs = jax.lax.scan(step, (h0, c0), jnp.transpose(x, (1, 0, 2)))
        hs = hs[1:]                                                # drop t=0
        out = (jnp.dot(hs.astype(jnp.bfloat16), w_fc_t,
                       preferred_element_type=jnp.float32)
               + self.b_fc[None, None, :])                         # (T-1, B, V)
        return jnp.transpose(out, (1, 0, 2))                       # (B, T-1, V)


if __name__ == "__main__":
    B, T, n_embd, hidden, vocab = 2, 8, 32, 32, 128

    model = DecoderRNNPallas(n_embd, hidden, vocab, num_layers=1, seed=0)

    key = jax.random.PRNGKey(0)
    kf, kc = jax.random.split(key)
    features = jax.random.normal(kf, (B, n_embd), jnp.float32)
    captions = jax.random.randint(kc, (B, T), 0, vocab, jnp.int32)

    out = jax.block_until_ready(model.forward(features, captions))
    ref = jax.block_until_ready(model.forward_ref(features, captions))

    assert out.shape == (B, T - 1, vocab), out.shape
    # bf16 MXU operands on both paths; tolerance covers rounding/order effects.
    np.testing.assert_allclose(np.asarray(out, dtype=np.float32),
                               np.asarray(ref, dtype=np.float32),
                               rtol=2e-2, atol=2e-2)
    print("KERNEL_OK")
</pallas_src>

<mosaic_0001>
module attributes {stable_mosaic.version = 11 : i64} {
  func.func @_lstm_kernel(%arg0: i32, %arg1: memref<8x2x32xbf16, #tpu.memory_space<vmem>>, %arg2: memref<32x128xbf16, #tpu.memory_space<vmem>>, %arg3: memref<32x128xbf16, #tpu.memory_space<vmem>>, %arg4: memref<1x128xf32, #tpu.memory_space<vmem>>, %arg5: memref<2x7x32xbf16, #tpu.memory_space<vmem>>, %arg6: memref<2x32xf32, #tpu.memory_space<vmem>>, %arg7: memref<2x32xf32, #tpu.memory_space<vmem>>) attributes {dimension_semantics = [#tpu.dimension_semantics<arbitrary>], iteration_bounds = array<i64: 1>, scalar_prefetch = 0 : i64, scratch_operands = 2 : i64, tpu.core_type = #tpu.core_type<tc>, window_params = [{pipeline_mode = #tpu.pipeline_mode<synchronous>, transform_indices = @transform_0, window_bounds = array<i64: 8, 2, 32>}, {pipeline_mode = #tpu.pipeline_mode<synchronous>, transform_indices = @transform_1, window_bounds = array<i64: 32, 128>}, {pipeline_mode = #tpu.pipeline_mode<synchronous>, transform_indices = @transform_2, window_bounds = array<i64: 32, 128>}, {pipeline_mode = #tpu.pipeline_mode<synchronous>, transform_indices = @transform_3, window_bounds = array<i64: 1, 128>}, {pipeline_mode = #tpu.pipeline_mode<synchronous>, transform_indices = @transform_4, window_bounds = array<i64: 2, 7, 32>}]} {
    %cst = arith.constant 0.000000e+00 : f32
    %0 = vector.broadcast %cst : f32 to vector<2x32xf32>
    %c0 = arith.constant 0 : index
    %c0_0 = arith.constant 0 : index
    %1 = vector.load %arg6[%c0, %c0_0] : memref<2x32xf32, #tpu.memory_space<vmem>>, vector<2x32xf32>
    tpu.vector_store %arg6[%c0, %c0_0], %0 {strides = array<i32>} : memref<2x32xf32, #tpu.memory_space<vmem>>, vector<2x32xf32>,
    %cst_1 = arith.constant 0.000000e+00 : f32
    %2 = vector.broadcast %cst_1 : f32 to vector<2x32xf32>
    %c0_2 = arith.constant 0 : index
    %c0_3 = arith.constant 0 : index
    %3 = vector.load %arg7[%c0_2, %c0_3] : memref<2x32xf32, #tpu.memory_space<vmem>>, vector<2x32xf32>
    tpu.vector_store %arg7[%c0_2, %c0_3], %2 {strides = array<i32>} : memref<2x32xf32, #tpu.memory_space<vmem>>, vector<2x32xf32>,
    %c0_4 = arith.constant 0 : index
    %c0_5 = arith.constant 0 : index
    %c0_6 = arith.constant 0 : index
    %4 = vector.load %arg1[%c0_4, %c0_5, %c0_6] : memref<8x2x32xbf16, #tpu.memory_space<vmem>>, vector<1x2x32xbf16>
    %5 = vector.shape_cast %4 : vector<1x2x32xbf16> to vector<2x32xbf16>
    %c0_7 = arith.constant 0 : index
    %c0_8 = arith.constant 0 : index
    %6 = vector.load %arg6[%c0_7, %c0_8] : memref<2x32xf32, #tpu.memory_space<vmem>>, vector<2x32xf32>
    %7 = arith.truncf %6 : vector<2x32xf32> to vector<2x32xbf16>
    %c0_9 = arith.constant 0 : index
    %c0_10 = arith.constant 0 : index
    %8 = vector.load %arg2[%c0_9, %c0_10] : memref<32x128xbf16, #tpu.memory_space<vmem>>, vector<32x128xbf16>
    %cst_11 = arith.constant dense<0.000000e+00> : vector<2x128xf32>
    %9 = tpu.matmul %5, %8, %cst_11 {dimension_numbers = #tpu.dot_dimension_numbers<[1], [0], [0], [1], [0, 0, 1, 1], [], []>} : vector<2x32xbf16>, vector<32x128xbf16>, vector<2x128xf32> -> vector<2x128xf32>
    %c0_12 = arith.constant 0 : index
    %c0_13 = arith.constant 0 : index
    %10 = vector.load %arg3[%c0_12, %c0_13] : memref<32x128xbf16, #tpu.memory_space<vmem>>, vector<32x128xbf16>
    %cst_14 = arith.constant dense<0.000000e+00> : vector<2x128xf32>
    %11 = tpu.matmul %7, %10, %cst_14 {dimension_numbers = #tpu.dot_dimension_numbers<[1], [0], [0], [1], [0, 0, 1, 1], [], []>} : vector<2x32xbf16>, vector<32x128xbf16>, vector<2x128xf32> -> vector<2x128xf32>
    %12 = arith.addf %9, %11 : vector<2x128xf32>
    %c0_15 = arith.constant 0 : index
    %c0_16 = arith.constant 0 : index
    %13 = vector.load %arg4[%c0_15, %c0_16] : memref<1x128xf32, #tpu.memory_space<vmem>>, vector<1x128xf32>
    %14 = vector.broadcast %13 : vector<1x128xf32> to vector<2x128xf32>
    %15 = arith.addf %12, %14 : vector<2x128xf32>
    %16 = vector.extract_strided_slice %15 {offsets = [0, 0], sizes = [2, 96], strides = [1, 1]} : vector<2x128xf32> to vector<2x96xf32>
    %17 = arith.negf %16 : vector<2x96xf32>
    %18 = math.exp %17 : vector<2x96xf32>
    %cst_17 = arith.constant 1.000000e+00 : f32
    %19 = vector.broadcast %cst_17 : f32 to vector<2x96xf32>
    %20 = arith.addf %19, %18 : vector<2x96xf32>
    %21 = arith.divf %19, %20 : vector<2x96xf32>
    %22 = vector.extract_strided_slice %15 {offsets = [0, 96], sizes = [2, 32], strides = [1, 1]} : vector<2x128xf32> to vector<2x32xf32>
    %23 = math.tanh %22 : vector<2x32xf32>
    %24 = vector.extract_strided_slice %21 {offsets = [0, 32], sizes = [2, 32], strides = [1, 1]} : vector<2x96xf32> to vector<2x32xf32>
    %c0_18 = arith.constant 0 : index
    %c0_19 = arith.constant 0 : index
    %25 = vector.load %arg7[%c0_18, %c0_19] : memref<2x32xf32, #tpu.memory_space<vmem>>, vector<2x32xf32>
    %26 = arith.mulf %24, %25 : vector<2x32xf32>
    %27 = vector.extract_strided_slice %21 {offsets = [0, 0], sizes = [2, 32], strides = [1, 1]} : vector<2x96xf32> to vector<2x32xf32>
    %28 = arith.mulf %27, %23 : vector<2x32xf32>
    %29 = arith.addf %26, %28 : vector<2x32xf32>
    %30 = vector.extract_strided_slice %21 {offsets = [0, 64], sizes = [2, 32], strides = [1, 1]} : vector<2x96xf32> to vector<2x32xf32>
    %31 = math.tanh %29 : vector<2x32xf32>
    %32 = arith.mulf %30, %31 : vector<2x32xf32>
    %c0_20 = arith.constant 0 : index
    %c0_21 = arith.constant 0 : index
    %33 = vector.load %arg7[%c0_20, %c0_21] : memref<2x32xf32, #tpu.memory_space<vmem>>, vector<2x32xf32>
    tpu.vector_store %arg7[%c0_20, %c0_21], %29 {strides = array<i32>} : memref<2x32xf32, #tpu.memory_space<vmem>>, vector<2x32xf32>,
    %c0_22 = arith.constant 0 : index
    %c0_23 = arith.constant 0 : index
    %34 = vector.load %arg6[%c0_22, %c0_23] : memref<2x32xf32, #tpu.memory_space<vmem>>, vector<2x32xf32>
    tpu.vector_store %arg6[%c0_22, %c0_23], %32 {strides = array<i32>} : memref<2x32xf32, #tpu.memory_space<vmem>>, vector<2x32xf32>,
    %c1 = arith.constant 1 : index
    %c0_24 = arith.constant 0 : index
    %c0_25 = arith.constant 0 : index
    %35 = vector.load %arg1[%c1, %c0_24, %c0_25] : memref<8x2x32xbf16, #tpu.memory_space<vmem>>, vector<1x2x32xbf16>
    %36 = vector.shape_cast %35 : vector<1x2x32xbf16> to vector<2x32xbf16>
    %c0_26 = arith.constant 0 : index
    %c0_27 = arith.constant 0 : index
    %37 = vector.load %arg6[%c0_26, %c0_27] : memref<2x32xf32, #tpu.memory_space<vmem>>, vector<2x32xf32>
    %38 = arith.truncf %37 : vector<2x32xf32> to vector<2x32xbf16>
    %c0_28 = arith.constant 0 : index
    %c0_29 = arith.constant 0 : index
    %39 = vector.load %arg2[%c0_28, %c0_29] : memref<32x128xbf16, #tpu.memory_space<vmem>>, vector<32x128xbf16>
    %cst_30 = arith.constant dense<0.000000e+00> : vector<2x128xf32>
    %40 = tpu.matmul %36, %39, %cst_30 {dimension_numbers = #tpu.dot_dimension_numbers<[1], [0], [0], [1], [0, 0, 1, 1], [], []>} : vector<2x32xbf16>, vector<32x128xbf16>, vector<2x128xf32> -> vector<2x128xf32>
    %c0_31 = arith.constant 0 : index
    %c0_32 = arith.constant 0 : index
    %41 = vector.load %arg3[%c0_31, %c0_32] : memref<32x128xbf16, #tpu.memory_space<vmem>>, vector<32x128xbf16>
    %cst_33 = arith.constant dense<0.000000e+00> : vector<2x128xf32>
    %42 = tpu.matmul %38, %41, %cst_33 {dimension_numbers = #tpu.dot_dimension_numbers<[1], [0], [0], [1], [0, 0, 1, 1], [], []>} : vector<2x32xbf16>, vector<32x128xbf16>, vector<2x128xf32> -> vector<2x128xf32>
    %43 = arith.addf %40, %42 : vector<2x128xf32>
    %c0_34 = arith.constant 0 : index
    %c0_35 = arith.constant 0 : index
    %44 = vector.load %arg4[%c0_34, %c0_35] : memref<1x128xf32, #tpu.memory_space<vmem>>, vector<1x128xf32>
    %45 = vector.broadcast %44 : vector<1x128xf32> to vector<2x128xf32>
    %46 = arith.addf %43, %45 : vector<2x128xf32>
    %47 = vector.extract_strided_slice %46 {offsets = [0, 0], sizes = [2, 96], strides = [1, 1]} : vector<2x128xf32> to vector<2x96xf32>
    %48 = arith.negf %47 : vector<2x96xf32>
    %49 = math.exp %48 : vector<2x96xf32>
    %cst_36 = arith.constant 1.000000e+00 : f32
    %50 = vector.broadcast %cst_36 : f32 to vector<2x96xf32>
    %51 = arith.addf %50, %49 : vector<2x96xf32>
    %52 = arith.divf %50, %51 : vector<2x96xf32>
    %53 = vector.extract_strided_slice %46 {offsets = [0, 96], sizes = [2, 32], strides = [1, 1]} : vector<2x128xf32> to vector<2x32xf32>
    %54 = math.tanh %53 : vector<2x32xf32>
    %55 = vector.extract_strided_slice %52 {offsets = [0, 32], sizes = [2, 32], strides = [1, 1]} : vector<2x96xf32> to vector<2x32xf32>
    %c0_37 = arith.constant 0 : index
    %c0_38 = arith.constant 0 : index
    %56 = vector.load %arg7[%c0_37, %c0_38] : memref<2x32xf32, #tpu.memory_space<vmem>>, vector<2x32xf32>
    %57 = arith.mulf %55, %56 : vector<2x32xf32>
    %58 = vector.extract_strided_slice %52 {offsets = [0, 0], sizes = [2, 32], strides = [1, 1]} : vector<2x96xf32> to vector<2x32xf32>
    %59 = arith.mulf %58, %54 : vector<2x32xf32>
    %60 = arith.addf %57, %59 : vector<2x32xf32>
    %61 = vector.extract_strided_slice %52 {offsets = [0, 64], sizes = [2, 32], strides = [1, 1]} : vector<2x96xf32> to vector<2x32xf32>
    %62 = math.tanh %60 : vector<2x32xf32>
    %63 = arith.mulf %61, %62 : vector<2x32xf32>
    %c0_39 = arith.constant 0 : index
    %c0_40 = arith.constant 0 : index
    %64 = vector.load %arg7[%c0_39, %c0_40] : memref<2x32xf32, #tpu.memory_space<vmem>>, vector<2x32xf32>
    tpu.vector_store %arg7[%c0_39, %c0_40], %60 {strides = array<i32>} : memref<2x32xf32, #tpu.memory_space<vmem>>, vector<2x32xf32>,
    %c0_41 = arith.constant 0 : index
    %c0_42 = arith.constant 0 : index
    %65 = vector.load %arg6[%c0_41, %c0_42] : memref<2x32xf32, #tpu.memory_space<vmem>>, vector<2x32xf32>
    tpu.vector_store %arg6[%c0_41, %c0_42], %63 {strides = array<i32>} : memref<2x32xf32, #tpu.memory_space<vmem>>, vector<2x32xf32>,
    %66 = arith.truncf %63 : vector<2x32xf32> to vector<2x32xbf16>
    %c0_43 = arith.constant 0 : index
    %c0_44 = arith.constant 0 : index
    %c0_45 = arith.constant 0 : index
    %67 = vector.load %arg5[%c0_43, %c0_44, %c0_45] : memref<2x7x32xbf16, #tpu.memory_space<vmem>>, vector<2x1x32xbf16>
    %68 = vector.shape_cast %67 : vector<2x1x32xbf16> to vector<2x32xbf16>
    %69 = vector.shape_cast %66 : vector<2x32xbf16> to vector<2x1x32xbf16>
    tpu.vector_store %arg5[%c0_43, %c0_44, %c0_45], %69 {strides = array<i32>} : memref<2x7x32xbf16, #tpu.memory_space<vmem>>, vector<2x1x32xbf16>,
    %c2 = arith.constant 2 : index
    %c0_46 = arith.constant 0 : index
    %c0_47 = arith.constant 0 : index
    %70 = vector.load %arg1[%c2, %c0_46, %c0_47] : memref<8x2x32xbf16, #tpu.memory_space<vmem>>, vector<1x2x32xbf16>
    %71 = vector.shape_cast %70 : vector<1x2x32xbf16> to vector<2x32xbf16>
    %c0_48 = arith.constant 0 : index
    %c0_49 = arith.constant 0 : index
    %72 = vector.load %arg6[%c0_48, %c0_49] : memref<2x32xf32, #tpu.memory_space<vmem>>, vector<2x32xf32>
    %73 = arith.truncf %72 : vector<2x32xf32> to vector<2x32xbf16>
    %c0_50 = arith.constant 0 : index
    %c0_51 = arith.constant 0 : index
    %74 = vector.load %arg2[%c0_50, %c0_51] : memref<32x128xbf16, #tpu.memory_space<vmem>>, vector<32x128xbf16>
    %cst_52 = arith.constant dense<0.000000e+00> : vector<2x128xf32>
    %75 = tpu.matmul %71, %74, %cst_52 {dimension_numbers = #tpu.dot_dimension_numbers<[1], [0], [0], [1], [0, 0, 1, 1], [], []>} : vector<2x32xbf16>, vector<32x128xbf16>, vector<2x128xf32> -> vector<2x128xf32>
    %c0_53 = arith.constant 0 : index
    %c0_54 = arith.constant 0 : index
    %76 = vector.load %arg3[%c0_53, %c0_54] : memref<32x128xbf16, #tpu.memory_space<vmem>>, vector<32x128xbf16>
    %cst_55 = arith.constant dense<0.000000e+00> : vector<2x128xf32>
    %77 = tpu.matmul %73, %76, %cst_55 {dimension_numbers = #tpu.dot_dimension_numbers<[1], [0], [0], [1], [0, 0, 1, 1], [], []>} : vector<2x32xbf16>, vector<32x128xbf16>, vector<2x128xf32> -> vector<2x128xf32>
    %78 = arith.addf %75, %77 : vector<2x128xf32>
    %c0_56 = arith.constant 0 : index
    %c0_57 = arith.constant 0 : index
    %79 = vector.load %arg4[%c0_56, %c0_57] : memref<1x128xf32, #tpu.memory_space<vmem>>, vector<1x128xf32>
    %80 = vector.broadcast %79 : vector<1x128xf32> to vector<2x128xf32>
    %81 = arith.addf %78, %80 : vector<2x128xf32>
    %82 = vector.extract_strided_slice %81 {offsets = [0, 0], sizes = [2, 96], strides = [1, 1]} : vector<2x128xf32> to vector<2x96xf32>
    %83 = arith.negf %82 : vector<2x96xf32>
    %84 = math.exp %83 : vector<2x96xf32>
    %cst_58 = arith.constant 1.000000e+00 : f32
    %85 = vector.broadcast %cst_58 : f32 to vector<2x96xf32>
    %86 = arith.addf %85, %84 : vector<2x96xf32>
    %87 = arith.divf %85, %86 : vector<2x96xf32>
    %88 = vector.extract_strided_slice %81 {offsets = [0, 96], sizes = [2, 32], strides = [1, 1]} : vector<2x128xf32> to vector<2x32xf32>
    %89 = math.tanh %88 : vector<2x32xf32>
    %90 = vector.extract_strided_slice %87 {offsets = [0, 32], sizes = [2, 32], strides = [1, 1]} : vector<2x96xf32> to vector<2x32xf32>
    %c0_59 = arith.constant 0 : index
    %c0_60 = arith.constant 0 : index
    %91 = vector.load %arg7[%c0_59, %c0_60] : memref<2x32xf32, #tpu.memory_space<vmem>>, vector<2x32xf32>
    %92 = arith.mulf %90, %91 : vector<2x32xf32>
    %93 = vector.extract_strided_slice %87 {offsets = [0, 0], sizes = [2, 32], strides = [1, 1]} : vector<2x96xf32> to vector<2x32xf32>
    %94 = arith.mulf %93, %89 : vector<2x32xf32>
    %95 = arith.addf %92, %94 : vector<2x32xf32>
    %96 = vector.extract_strided_slice %87 {offsets = [0, 64], sizes = [2, 32], strides = [1, 1]} : vector<2x96xf32> to vector<2x32xf32>
    %97 = math.tanh %95 : vector<2x32xf32>
    %98 = arith.mulf %96, %97 : vector<2x32xf32>
    %c0_61 = arith.constant 0 : index
    %c0_62 = arith.constant 0 : index
    %99 = vector.load %arg7[%c0_61, %c0_62] : memref<2x32xf32, #tpu.memory_space<vmem>>, vector<2x32xf32>
    tpu.vector_store %arg7[%c0_61, %c0_62], %95 {strides = array<i32>} : memref<2x32xf32, #tpu.memory_space<vmem>>, vector<2x32xf32>,
    %c0_63 = arith.constant 0 : index
    %c0_64 = arith.constant 0 : index
    %100 = vector.load %arg6[%c0_63, %c0_64] : memref<2x32xf32, #tpu.memory_space<vmem>>, vector<2x32xf32>
    tpu.vector_store %arg6[%c0_63, %c0_64], %98 {strides = array<i32>} : memref<2x32xf32, #tpu.memory_space<vmem>>, vector<2x32xf32>,
    %101 = arith.truncf %98 : vector<2x32xf32> to vector<2x32xbf16>
    %c0_65 = arith.constant 0 : index
    %c1_66 = arith.constant 1 : index
    %c0_67 = arith.constant 0 : index
    %102 = vector.load %arg5[%c0_65, %c1_66, %c0_67] : memref<2x7x32xbf16, #tpu.memory_space<vmem>>, vector<2x1x32xbf16>
    %103 = vector.shape_cast %102 : vector<2x1x32xbf16> to vector<2x32xbf16>
    %104 = vector.shape_cast %101 : vector<2x32xbf16> to vector<2x1x32xbf16>
    tpu.vector_store %arg5[%c0_65, %c1_66, %c0_67], %104 {strides = array<i32>} : memref<2x7x32xbf16, #tpu.memory_space<vmem>>, vector<2x1x32xbf16>,
    %c3 = arith.constant 3 : index
    %c0_68 = arith.constant 0 : index
    %c0_69 = arith.constant 0 : index
    %105 = vector.load %arg1[%c3, %c0_68, %c0_69] : memref<8x2x32xbf16, #tpu.memory_space<vmem>>, vector<1x2x32xbf16>
    %106 = vector.shape_cast %105 : vector<1x2x32xbf16> to vector<2x32xbf16>
    %c0_70 = arith.constant 0 : index
    %c0_71 = arith.constant 0 : index
    %107 = vector.load %arg6[%c0_70, %c0_71] : memref<2x32xf32, #tpu.memory_space<vmem>>, vector<2x32xf32>
    %108 = arith.truncf %107 : vector<2x32xf32> to vector<2x32xbf16>
    %c0_72 = arith.constant 0 : index
    %c0_73 = arith.constant 0 : index
    %109 = vector.load %arg2[%c0_72, %c0_73] : memref<32x128xbf16, #tpu.memory_space<vmem>>, vector<32x128xbf16>
    %cst_74 = arith.constant dense<0.000000e+00> : vector<2x128xf32>
    %110 = tpu.matmul %106, %109, %cst_74 {dimension_numbers = #tpu.dot_dimension_numbers<[1], [0], [0], [1], [0, 0, 1, 1], [], []>} : vector<2x32xbf16>, vector<32x128xbf16>, vector<2x128xf32> -> vector<2x128xf32>
    %c0_75 = arith.constant 0 : index
    %c0_76 = arith.constant 0 : index
    %111 = vector.load %arg3[%c0_75, %c0_76] : memref<32x128xbf16, #tpu.memory_space<vmem>>, vector<32x128xbf16>
    %cst_77 = arith.constant dense<0.000000e+00> : vector<2x128xf32>
    %112 = tpu.matmul %108, %111, %cst_77 {dimension_numbers = #tpu.dot_dimension_numbers<[1], [0], [0], [1], [0, 0, 1, 1], [], []>} : vector<2x32xbf16>, vector<32x128xbf16>, vector<2x128xf32> -> vector<2x128xf32>
    %113 = arith.addf %110, %112 : vector<2x128xf32>
    %c0_78 = arith.constant 0 : index
    %c0_79 = arith.constant 0 : index
    %114 = vector.load %arg4[%c0_78, %c0_79] : memref<1x128xf32, #tpu.memory_space<vmem>>, vector<1x128xf32>
    %115 = vector.broadcast %114 : vector<1x128xf32> to vector<2x128xf32>
    %116 = arith.addf %113, %115 : vector<2x128xf32>
    %117 = vector.extract_strided_slice %116 {offsets = [0, 0], sizes = [2, 96], strides = [1, 1]} : vector<2x128xf32> to vector<2x96xf32>
    %118 = arith.negf %117 : vector<2x96xf32>
    %119 = math.exp %118 : vector<2x96xf32>
    %cst_80 = arith.constant 1.000000e+00 : f32
    %120 = vector.broadcast %cst_80 : f32 to vector<2x96xf32>
    %121 = arith.addf %120, %119 : vector<2x96xf32>
    %122 = arith.divf %120, %121 : vector<2x96xf32>
    %123 = vector.extract_strided_slice %116 {offsets = [0, 96], sizes = [2, 32], strides = [1, 1]} : vector<2x128xf32> to vector<2x32xf32>
    %124 = math.tanh %123 : vector<2x32xf32>
    %125 = vector.extract_strided_slice %122 {offsets = [0, 32], sizes = [2, 32], strides = [1, 1]} : vector<2x96xf32> to vector<2x32xf32>
    %c0_81 = arith.constant 0 : index
    %c0_82 = arith.constant 0 : index
    %126 = vector.load %arg7[%c0_81, %c0_82] : memref<2x32xf32, #tpu.memory_space<vmem>>, vector<2x32xf32>
    %127 = arith.mulf %125, %126 : vector<2x32xf32>
    %128 = vector.extract_strided_slice %122 {offsets = [0, 0], sizes = [2, 32], strides = [1, 1]} : vector<2x96xf32> to vector<2x32xf32>
    %129 = arith.mulf %128, %124 : vector<2x32xf32>
    %130 = arith.addf %127, %129 : vector<2x32xf32>
    %131 = vector.extract_strided_slice %122 {offsets = [0, 64], sizes = [2, 32], strides = [1, 1]} : vector<2x96xf32> to vector<2x32xf32>
    %132 = math.tanh %130 : vector<2x32xf32>
    %133 = arith.mulf %131, %132 : vector<2x32xf32>
    %c0_83 = arith.constant 0 : index
    %c0_84 = arith.constant 0 : index
    %134 = vector.load %arg7[%c0_83, %c0_84] : memref<2x32xf32, #tpu.memory_space<vmem>>, vector<2x32xf32>
    tpu.vector_store %arg7[%c0_83, %c0_84], %130 {strides = array<i32>} : memref<2x32xf32, #tpu.memory_space<vmem>>, vector<2x32xf32>,
    %c0_85 = arith.constant 0 : index
    %c0_86 = arith.constant 0 : index
    %135 = vector.load %arg6[%c0_85, %c0_86] : memref<2x32xf32, #tpu.memory_space<vmem>>, vector<2x32xf32>
    tpu.vector_store %arg6[%c0_85, %c0_86], %133 {strides = array<i32>} : memref<2x32xf32, #tpu.memory_space<vmem>>, vector<2x32xf32>,
    %136 = arith.truncf %133 : vector<2x32xf32> to vector<2x32xbf16>
    %c0_87 = arith.constant 0 : index
    %c2_88 = arith.constant 2 : index
    %c0_89 = arith.constant 0 : index
    %137 = vector.load %arg5[%c0_87, %c2_88, %c0_89] : memref<2x7x32xbf16, #tpu.memory_space<vmem>>, vector<2x1x32xbf16>
    %138 = vector.shape_cast %137 : vector<2x1x32xbf16> to vector<2x32xbf16>
    %139 = vector.shape_cast %136 : vector<2x32xbf16> to vector<2x1x32xbf16>
    tpu.vector_store %arg5[%c0_87, %c2_88, %c0_89], %139 {strides = array<i32>} : memref<2x7x32xbf16, #tpu.memory_space<vmem>>, vector<2x1x32xbf16>,
    %c4 = arith.constant 4 : index
    %c0_90 = arith.constant 0 : index
    %c0_91 = arith.constant 0 : index
    %140 = vector.load %arg1[%c4, %c0_90, %c0_91] : memref<8x2x32xbf16, #tpu.memory_space<vmem>>, vector<1x2x32xbf16>
    %141 = vector.shape_cast %140 : vector<1x2x32xbf16> to vector<2x32xbf16>
    %c0_92 = arith.constant 0 : index
    %c0_93 = arith.constant 0 : index
    %142 = vector.load %arg6[%c0_92, %c0_93] : memref<2x32xf32, #tpu.memory_space<vmem>>, vector<2x32xf32>
    %143 = arith.truncf %142 : vector<2x32xf32> to vector<2x32xbf16>
    %c0_94 = arith.constant 0 : index
    %c0_95 = arith.constant 0 : index
    %144 = vector.load %arg2[%c0_94, %c0_95] : memref<32x128xbf16, #tpu.memory_space<vmem>>, vector<32x128xbf16>
    %cst_96 = arith.constant dense<0.000000e+00> : vector<2x128xf32>
    %145 = tpu.matmul %141, %144, %cst_96 {dimension_numbers = #tpu.dot_dimension_numbers<[1], [0], [0], [1], [0, 0, 1, 1], [], []>} : vector<2x32xbf16>, vector<32x128xbf16>, vector<2x128xf32> -> vector<2x128xf32>
    %c0_97 = arith.constant 0 : index
    %c0_98 = arith.constant 0 : index
    %146 = vector.load %arg3[%c0_97, %c0_98] : memref<32x128xbf16, #tpu.memory_space<vmem>>, vector<32x128xbf16>
    %cst_99 = arith.constant dense<0.000000e+00> : vector<2x128xf32>
    %147 = tpu.matmul %143, %146, %cst_99 {dimension_numbers = #tpu.dot_dimension_numbers<[1], [0], [0], [1], [0, 0, 1, 1], [], []>} : vector<2x32xbf16>, vector<32x128xbf16>, vector<2x128xf32> -> vector<2x128xf32>
    %148 = arith.addf %145, %147 : vector<2x128xf32>
    %c0_100 = arith.constant 0 : index
    %c0_101 = arith.constant 0 : index
    %149 = vector.load %arg4[%c0_100, %c0_101] : memref<1x128xf32, #tpu.memory_space<vmem>>, vector<1x128xf32>
    %150 = vector.broadcast %149 : vector<1x128xf32> to vector<2x128xf32>
    %151 = arith.addf %148, %150 : vector<2x128xf32>
    %152 = vector.extract_strided_slice %151 {offsets = [0, 0], sizes = [2, 96], strides = [1, 1]} : vector<2x128xf32> to vector<2x96xf32>
    %153 = arith.negf %152 : vector<2x96xf32>
    %154 = math.exp %153 : vector<2x96xf32>
    %cst_102 = arith.constant 1.000000e+00 : f32
    %155 = vector.broadcast %cst_102 : f32 to vector<2x96xf32>
    %156 = arith.addf %155, %154 : vector<2x96xf32>
    %157 = arith.divf %155, %156 : vector<2x96xf32>
    %158 = vector.extract_strided_slice %151 {offsets = [0, 96], sizes = [2, 32], strides = [1, 1]} : vector<2x128xf32> to vector<2x32xf32>
    %159 = math.tanh %158 : vector<2x32xf32>
    %160 = vector.extract_strided_slice %157 {offsets = [0, 32], sizes = [2, 32], strides = [1, 1]} : vector<2x96xf32> to vector<2x32xf32>
    %c0_103 = arith.constant 0 : index
    %c0_104 = arith.constant 0 : index
    %161 = vector.load %arg7[%c0_103, %c0_104] : memref<2x32xf32, #tpu.memory_space<vmem>>, vector<2x32xf32>
    %162 = arith.mulf %160, %161 : vector<2x32xf32>
    %163 = vector.extract_strided_slice %157 {offsets = [0, 0], sizes = [2, 32], strides = [1, 1]} : vector<2x96xf32> to vector<2x32xf32>
    %164 = arith.mulf %163, %159 : vector<2x32xf32>
    %165 = arith.addf %162, %164 : vector<2x32xf32>
    %166 = vector.extract_strided_slice %157 {offsets = [0, 64], sizes = [2, 32], strides = [1, 1]} : vector<2x96xf32> to vector<2x32xf32>
    %167 = math.tanh %165 : vector<2x32xf32>
    %168 = arith.mulf %166, %167 : vector<2x32xf32>
    %c0_105 = arith.constant 0 : index
    %c0_106 = arith.constant 0 : index
    %169 = vector.load %arg7[%c0_105, %c0_106] : memref<2x32xf32, #tpu.memory_space<vmem>>, vector<2x32xf32>
    tpu.vector_store %arg7[%c0_105, %c0_106], %165 {strides = array<i32>} : memref<2x32xf32, #tpu.memory_space<vmem>>, vector<2x32xf32>,
    %c0_107 = arith.constant 0 : index
    %c0_108 = arith.constant 0 : index
    %170 = vector.load %arg6[%c0_107, %c0_108] : memref<2x32xf32, #tpu.memory_space<vmem>>, vector<2x32xf32>
    tpu.vector_store %arg6[%c0_107, %c0_108], %168 {strides = array<i32>} : memref<2x32xf32, #tpu.memory_space<vmem>>, vector<2x32xf32>,
    %171 = arith.truncf %168 : vector<2x32xf32> to vector<2x32xbf16>
    %c0_109 = arith.constant 0 : index
    %c3_110 = arith.constant 3 : index
    %c0_111 = arith.constant 0 : index
    %172 = vector.load %arg5[%c0_109, %c3_110, %c0_111] : memref<2x7x32xbf16, #tpu.memory_space<vmem>>, vector<2x1x32xbf16>
    %173 = vector.shape_cast %172 : vector<2x1x32xbf16> to vector<2x32xbf16>
    %174 = vector.shape_cast %171 : vector<2x32xbf16> to vector<2x1x32xbf16>
    tpu.vector_store %arg5[%c0_109, %c3_110, %c0_111], %174 {strides = array<i32>} : memref<2x7x32xbf16, #tpu.memory_space<vmem>>, vector<2x1x32xbf16>,
    %c5 = arith.constant 5 : index
    %c0_112 = arith.constant 0 : index
    %c0_113 = arith.constant 0 : index
    %175 = vector.load %arg1[%c5, %c0_112, %c0_113] : memref<8x2x32xbf16, #tpu.memory_space<vmem>>, vector<1x2x32xbf16>
    %176 = vector.shape_cast %175 : vector<1x2x32xbf16> to vector<2x32xbf16>
    %c0_114 = arith.constant 0 : index
    %c0_115 = arith.constant 0 : index
    %177 = vector.load %arg6[%c0_114, %c0_115] : memref<2x32xf32, #tpu.memory_space<vmem>>, vector<2x32xf32>
    %178 = arith.truncf %177 : vector<2x32xf32> to vector<2x32xbf16>
    %c0_116 = arith.constant 0 : index
    %c0_117 = arith.constant 0 : index
    %179 = vector.load %arg2[%c0_116, %c0_117] : memref<32x128xbf16, #tpu.memory_space<vmem>>, vector<32x128xbf16>
    %cst_118 = arith.constant dense<0.000000e+00> : vector<2x128xf32>
    %180 = tpu.matmul %176, %179, %cst_118 {dimension_numbers = #tpu.dot_dimension_numbers<[1], [0], [0], [1], [0, 0, 1, 1], [], []>} : vector<2x32xbf16>, vector<32x128xbf16>, vector<2x128xf32> -> vector<2x128xf32>
    %c0_119 = arith.constant 0 : index
    %c0_120 = arith.constant 0 : index
    %181 = vector.load %arg3[%c0_119, %c0_120] : memref<32x128xbf16, #tpu.memory_space<vmem>>, vector<32x128xbf16>
    %cst_121 = arith.constant dense<0.000000e+00> : vector<2x128xf32>
    %182 = tpu.matmul %178, %181, %cst_121 {dimension_numbers = #tpu.dot_dimension_numbers<[1], [0], [0], [1], [0, 0, 1, 1], [], []>} : vector<2x32xbf16>, vector<32x128xbf16>, vector<2x128xf32> -> vector<2x128xf32>
    %183 = arith.addf %180, %182 : vector<2x128xf32>
    %c0_122 = arith.constant 0 : index
    %c0_123 = arith.constant 0 : index
    %184 = vector.load %arg4[%c0_122, %c0_123] : memref<1x128xf32, #tpu.memory_space<vmem>>, vector<1x128xf32>
    %185 = vector.broadcast %184 : vector<1x128xf32> to vector<2x128xf32>
    %186 = arith.addf %183, %185 : vector<2x128xf32>
    %187 = vector.extract_strided_slice %186 {offsets = [0, 0], sizes = [2, 96], strides = [1, 1]} : vector<2x128xf32> to vector<2x96xf32>
    %188 = arith.negf %187 : vector<2x96xf32>
    %189 = math.exp %188 : vector<2x96xf32>
    %cst_124 = arith.constant 1.000000e+00 : f32
    %190 = vector.broadcast %cst_124 : f32 to vector<2x96xf32>
    %191 = arith.addf %190, %189 : vector<2x96xf32>
    %192 = arith.divf %190, %191 : vector<2x96xf32>
    %193 = vector.extract_strided_slice %186 {offsets = [0, 96], sizes = [2, 32], strides = [1, 1]} : vector<2x128xf32> to vector<2x32xf32>
    %194 = math.tanh %193 : vector<2x32xf32>
    %195 = vector.extract_strided_slice %192 {offsets = [0, 32], sizes = [2, 32], strides = [1, 1]} : vector<2x96xf32> to vector<2x32xf32>
    %c0_125 = arith.constant 0 : index
    %c0_126 = arith.constant 0 : index
    %196 = vector.load %arg7[%c0_125, %c0_126] : memref<2x32xf32, #tpu.memory_space<vmem>>, vector<2x32xf32>
    %197 = arith.mulf %195, %196 : vector<2x32xf32>
    %198 = vector.extract_strided_slice %192 {offsets = [0, 0], sizes = [2, 32], strides = [1, 1]} : vector<2x96xf32> to vector<2x32xf32>
    %199 = arith.mulf %198, %194 : vector<2x32xf32>
    %200 = arith.addf %197, %199 : vector<2x32xf32>
    %201 = vector.extract_strided_slice %192 {offsets = [0, 64], sizes = [2, 32], strides = [1, 1]} : vector<2x96xf32> to vector<2x32xf32>
    %202 = math.tanh %200 : vector<2x32xf32>
    %203 = arith.mulf %201, %202 : vector<2x32xf32>
    %c0_127 = arith.constant 0 : index
    %c0_128 = arith.constant 0 : index
    %204 = vector.load %arg7[%c0_127, %c0_128] : memref<2x32xf32, #tpu.memory_space<vmem>>, vector<2x32xf32>
    tpu.vector_store %arg7[%c0_127, %c0_128], %200 {strides = array<i32>} : memref<2x32xf32, #tpu.memory_space<vmem>>, vector<2x32xf32>,
    %c0_129 = arith.constant 0 : index
    %c0_130 = arith.constant 0 : index
    %205 = vector.load %arg6[%c0_129, %c0_130] : memref<2x32xf32, #tpu.memory_space<vmem>>, vector<2x32xf32>
    tpu.vector_store %arg6[%c0_129, %c0_130], %203 {strides = array<i32>} : memref<2x32xf32, #tpu.memory_space<vmem>>, vector<2x32xf32>,
    %206 = arith.truncf %203 : vector<2x32xf32> to vector<2x32xbf16>
    %c0_131 = arith.constant 0 : index
    %c4_132 = arith.constant 4 : index
    %c0_133 = arith.constant 0 : index
    %207 = vector.load %arg5[%c0_131, %c4_132, %c0_133] : memref<2x7x32xbf16, #tpu.memory_space<vmem>>, vector<2x1x32xbf16>
    %208 = vector.shape_cast %207 : vector<2x1x32xbf16> to vector<2x32xbf16>
    %209 = vector.shape_cast %206 : vector<2x32xbf16> to vector<2x1x32xbf16>
    tpu.vector_store %arg5[%c0_131, %c4_132, %c0_133], %209 {strides = array<i32>} : memref<2x7x32xbf16, #tpu.memory_space<vmem>>, vector<2x1x32xbf16>,
    %c6 = arith.constant 6 : index
    %c0_134 = arith.constant 0 : index
    %c0_135 = arith.constant 0 : index
    %210 = vector.load %arg1[%c6, %c0_134, %c0_135] : memref<8x2x32xbf16, #tpu.memory_space<vmem>>, vector<1x2x32xbf16>
    %211 = vector.shape_cast %210 : vector<1x2x32xbf16> to vector<2x32xbf16>
    %c0_136 = arith.constant 0 : index
    %c0_137 = arith.constant 0 : index
    %212 = vector.load %arg6[%c0_136, %c0_137] : memref<2x32xf32, #tpu.memory_space<vmem>>, vector<2x32xf32>
    %213 = arith.truncf %212 : vector<2x32xf32> to vector<2x32xbf16>
    %c0_138 = arith.constant 0 : index
    %c0_139 = arith.constant 0 : index
    %214 = vector.load %arg2[%c0_138, %c0_139] : memref<32x128xbf16, #tpu.memory_space<vmem>>, vector<32x128xbf16>
    %cst_140 = arith.constant dense<0.000000e+00> : vector<2x128xf32>
    %215 = tpu.matmul %211, %214, %cst_140 {dimension_numbers = #tpu.dot_dimension_numbers<[1], [0], [0], [1], [0, 0, 1, 1], [], []>} : vector<2x32xbf16>, vector<32x128xbf16>, vector<2x128xf32> -> vector<2x128xf32>
    %c0_141 = arith.constant 0 : index
    %c0_142 = arith.constant 0 : index
    %216 = vector.load %arg3[%c0_141, %c0_142] : memref<32x128xbf16, #tpu.memory_space<vmem>>, vector<32x128xbf16>
    %cst_143 = arith.constant dense<0.000000e+00> : vector<2x128xf32>
    %217 = tpu.matmul %213, %216, %cst_143 {dimension_numbers = #tpu.dot_dimension_numbers<[1], [0], [0], [1], [0, 0, 1, 1], [], []>} : vector<2x32xbf16>, vector<32x128xbf16>, vector<2x128xf32> -> vector<2x128xf32>
    %218 = arith.addf %215, %217 : vector<2x128xf32>
    %c0_144 = arith.constant 0 : index
    %c0_145 = arith.constant 0 : index
    %219 = vector.load %arg4[%c0_144, %c0_145] : memref<1x128xf32, #tpu.memory_space<vmem>>, vector<1x128xf32>
    %220 = vector.broadcast %219 : vector<1x128xf32> to vector<2x128xf32>
    %221 = arith.addf %218, %220 : vector<2x128xf32>
    %222 = vector.extract_strided_slice %221 {offsets = [0, 0], sizes = [2, 96], strides = [1, 1]} : vector<2x128xf32> to vector<2x96xf32>
    %223 = arith.negf %222 : vector<2x96xf32>
    %224 = math.exp %223 : vector<2x96xf32>
    %cst_146 = arith.constant 1.000000e+00 : f32
    %225 = vector.broadcast %cst_146 : f32 to vector<2x96xf32>
    %226 = arith.addf %225, %224 : vector<2x96xf32>
    %227 = arith.divf %225, %226 : vector<2x96xf32>
    %228 = vector.extract_strided_slice %221 {offsets = [0, 96], sizes = [2, 32], strides = [1, 1]} : vector<2x128xf32> to vector<2x32xf32>
    %229 = math.tanh %228 : vector<2x32xf32>
    %230 = vector.extract_strided_slice %227 {offsets = [0, 32], sizes = [2, 32], strides = [1, 1]} : vector<2x96xf32> to vector<2x32xf32>
    %c0_147 = arith.constant 0 : index
    %c0_148 = arith.constant 0 : index
    %231 = vector.load %arg7[%c0_147, %c0_148] : memref<2x32xf32, #tpu.memory_space<vmem>>, vector<2x32xf32>
    %232 = arith.mulf %230, %231 : vector<2x32xf32>
    %233 = vector.extract_strided_slice %227 {offsets = [0, 0], sizes = [2, 32], strides = [1, 1]} : vector<2x96xf32> to vector<2x32xf32>
    %234 = arith.mulf %233, %229 : vector<2x32xf32>
    %235 = arith.addf %232, %234 : vector<2x32xf32>
    %236 = vector.extract_strided_slice %227 {offsets = [0, 64], sizes = [2, 32], strides = [1, 1]} : vector<2x96xf32> to vector<2x32xf32>
    %237 = math.tanh %235 : vector<2x32xf32>
    %238 = arith.mulf %236, %237 : vector<2x32xf32>
    %c0_149 = arith.constant 0 : index
    %c0_150 = arith.constant 0 : index
    %239 = vector.load %arg7[%c0_149, %c0_150] : memref<2x32xf32, #tpu.memory_space<vmem>>, vector<2x32xf32>
    tpu.vector_store %arg7[%c0_149, %c0_150], %235 {strides = array<i32>} : memref<2x32xf32, #tpu.memory_space<vmem>>, vector<2x32xf32>,
    %c0_151 = arith.constant 0 : index
    %c0_152 = arith.constant 0 : index
    %240 = vector.load %arg6[%c0_151, %c0_152] : memref<2x32xf32, #tpu.memory_space<vmem>>, vector<2x32xf32>
    tpu.vector_store %arg6[%c0_151, %c0_152], %238 {strides = array<i32>} : memref<2x32xf32, #tpu.memory_space<vmem>>, vector<2x32xf32>,
    %241 = arith.truncf %238 : vector<2x32xf32> to vector<2x32xbf16>
    %c0_153 = arith.constant 0 : index
    %c5_154 = arith.constant 5 : index
    %c0_155 = arith.constant 0 : index
    %242 = vector.load %arg5[%c0_153, %c5_154, %c0_155] : memref<2x7x32xbf16, #tpu.memory_space<vmem>>, vector<2x1x32xbf16>
    %243 = vector.shape_cast %242 : vector<2x1x32xbf16> to vector<2x32xbf16>
    %244 = vector.shape_cast %241 : vector<2x32xbf16> to vector<2x1x32xbf16>
    tpu.vector_store %arg5[%c0_153, %c5_154, %c0_155], %244 {strides = array<i32>} : memref<2x7x32xbf16, #tpu.memory_space<vmem>>, vector<2x1x32xbf16>,
    %c7 = arith.constant 7 : index
    %c0_156 = arith.constant 0 : index
    %c0_157 = arith.constant 0 : index
    %245 = vector.load %arg1[%c7, %c0_156, %c0_157] : memref<8x2x32xbf16, #tpu.memory_space<vmem>>, vector<1x2x32xbf16>
    %246 = vector.shape_cast %245 : vector<1x2x32xbf16> to vector<2x32xbf16>
    %c0_158 = arith.constant 0 : index
    %c0_159 = arith.constant 0 : index
    %247 = vector.load %arg6[%c0_158, %c0_159] : memref<2x32xf32, #tpu.memory_space<vmem>>, vector<2x32xf32>
    %248 = arith.truncf %247 : vector<2x32xf32> to vector<2x32xbf16>
    %c0_160 = arith.constant 0 : index
    %c0_161 = arith.constant 0 : index
    %249 = vector.load %arg2[%c0_160, %c0_161] : memref<32x128xbf16, #tpu.memory_space<vmem>>, vector<32x128xbf16>
    %cst_162 = arith.constant dense<0.000000e+00> : vector<2x128xf32>
    %250 = tpu.matmul %246, %249, %cst_162 {dimension_numbers = #tpu.dot_dimension_numbers<[1], [0], [0], [1], [0, 0, 1, 1], [], []>} : vector<2x32xbf16>, vector<32x128xbf16>, vector<2x128xf32> -> vector<2x128xf32>
    %c0_163 = arith.constant 0 : index
    %c0_164 = arith.constant 0 : index
    %251 = vector.load %arg3[%c0_163, %c0_164] : memref<32x128xbf16, #tpu.memory_space<vmem>>, vector<32x128xbf16>
    %cst_165 = arith.constant dense<0.000000e+00> : vector<2x128xf32>
    %252 = tpu.matmul %248, %251, %cst_165 {dimension_numbers = #tpu.dot_dimension_numbers<[1], [0], [0], [1], [0, 0, 1, 1], [], []>} : vector<2x32xbf16>, vector<32x128xbf16>, vector<2x128xf32> -> vector<2x128xf32>
    %253 = arith.addf %250, %252 : vector<2x128xf32>
    %c0_166 = arith.constant 0 : index
    %c0_167 = arith.constant 0 : index
    %254 = vector.load %arg4[%c0_166, %c0_167] : memref<1x128xf32, #tpu.memory_space<vmem>>, vector<1x128xf32>
    %255 = vector.broadcast %254 : vector<1x128xf32> to vector<2x128xf32>
    %256 = arith.addf %253, %255 : vector<2x128xf32>
    %257 = vector.extract_strided_slice %256 {offsets = [0, 0], sizes = [2, 96], strides = [1, 1]} : vector<2x128xf32> to vector<2x96xf32>
    %258 = arith.negf %257 : vector<2x96xf32>
    %259 = math.exp %258 : vector<2x96xf32>
    %cst_168 = arith.constant 1.000000e+00 : f32
    %260 = vector.broadcast %cst_168 : f32 to vector<2x96xf32>
    %261 = arith.addf %260, %259 : vector<2x96xf32>
    %262 = arith.divf %260, %261 : vector<2x96xf32>
    %263 = vector.extract_strided_slice %256 {offsets = [0, 96], sizes = [2, 32], strides = [1, 1]} : vector<2x128xf32> to vector<2x32xf32>
    %264 = math.tanh %263 : vector<2x32xf32>
    %265 = vector.extract_strided_slice %262 {offsets = [0, 32], sizes = [2, 32], strides = [1, 1]} : vector<2x96xf32> to vector<2x32xf32>
    %c0_169 = arith.constant 0 : index
    %c0_170 = arith.constant 0 : index
    %266 = vector.load %arg7[%c0_169, %c0_170] : memref<2x32xf32, #tpu.memory_space<vmem>>, vector<2x32xf32>
    %267 = arith.mulf %265, %266 : vector<2x32xf32>
    %268 = vector.extract_strided_slice %262 {offsets = [0, 0], sizes = [2, 32], strides = [1, 1]} : vector<2x96xf32> to vector<2x32xf32>
    %269 = arith.mulf %268, %264 : vector<2x32xf32>
    %270 = arith.addf %267, %269 : vector<2x32xf32>
    %271 = vector.extract_strided_slice %262 {offsets = [0, 64], sizes = [2, 32], strides = [1, 1]} : vector<2x96xf32> to vector<2x32xf32>
    %272 = math.tanh %270 : vector<2x32xf32>
    %273 = arith.mulf %271, %272 : vector<2x32xf32>
    %c0_171 = arith.constant 0 : index
    %c0_172 = arith.constant 0 : index
    %274 = vector.load %arg7[%c0_171, %c0_172] : memref<2x32xf32, #tpu.memory_space<vmem>>, vector<2x32xf32>
    tpu.vector_store %arg7[%c0_171, %c0_172], %270 {strides = array<i32>} : memref<2x32xf32, #tpu.memory_space<vmem>>, vector<2x32xf32>,
    %c0_173 = arith.constant 0 : index
    %c0_174 = arith.constant 0 : index
    %275 = vector.load %arg6[%c0_173, %c0_174] : memref<2x32xf32, #tpu.memory_space<vmem>>, vector<2x32xf32>
    tpu.vector_store %arg6[%c0_173, %c0_174], %273 {strides = array<i32>} : memref<2x32xf32, #tpu.memory_space<vmem>>, vector<2x32xf32>,
    %276 = arith.truncf %273 : vector<2x32xf32> to vector<2x32xbf16>
    %c0_175 = arith.constant 0 : index
    %c6_176 = arith.constant 6 : index
    %c0_177 = arith.constant 0 : index
    %277 = vector.load %arg5[%c0_175, %c6_176, %c0_177] : memref<2x7x32xbf16, #tpu.memory_space<vmem>>, vector<2x1x32xbf16>
    %278 = vector.shape_cast %277 : vector<2x1x32xbf16> to vector<2x32xbf16>
    %279 = vector.shape_cast %276 : vector<2x32xbf16> to vector<2x1x32xbf16>
    tpu.vector_store %arg5[%c0_175, %c6_176, %c0_177], %279 {strides = array<i32>} : memref<2x7x32xbf16, #tpu.memory_space<vmem>>, vector<2x1x32xbf16>,
    return
  }
  func.func @transform_0(%arg0: i32) -> (i32, i32, i32) {
    %c0_i32 = arith.constant 0 : i32
    %c0_i32_0 = arith.constant 0 : i32
    %c0_i32_1 = arith.constant 0 : i32
    %c0_i32_2 = arith.constant 0 : i32
    return %c0_i32, %c0_i32_0, %c0_i32_1 : i32, i32, i32
  }
  func.func @transform_1(%arg0: i32) -> (i32, i32) {
    %c0_i32 = arith.constant 0 : i32
    %c0_i32_0 = arith.constant 0 : i32
    %c0_i32_1 = arith.constant 0 : i32
    return %c0_i32, %c0_i32_0 : i32, i32
  }
  func.func @transform_2(%arg0: i32) -> (i32, i32) {
    %c0_i32 = arith.constant 0 : i32
    %c0_i32_0 = arith.constant 0 : i32
    %c0_i32_1 = arith.constant 0 : i32
    return %c0_i32, %c0_i32_0 : i32, i32
  }
  func.func @transform_3(%arg0: i32) -> (i32, i32) {
    %c0_i32 = arith.constant 0 : i32
    %c0_i32_0 = arith.constant 0 : i32
    %c0_i32_1 = arith.constant 0 : i32
    return %c0_i32, %c0_i32_0 : i32, i32
  }
  func.func @transform_4(%arg0: i32) -> (i32, i32, i32) {
    %c0_i32 = arith.constant 0 : i32
    %c0_i32_0 = arith.constant 0 : i32
    %c0_i32_1 = arith.constant 0 : i32
    %c0_i32_2 = arith.constant 0 : i32
    return %c0_i32, %c0_i32_0, %c0_i32_1 : i32, i32, i32
  }
}

</mosaic_0001>

<bundles_post_ra>
// kernel: tpu_custom_call.1
= control target key start
LH: loop header
LB: loop body
LE: loop exit
PB: predicated region body
PF: predicated region fallthrough
CT: control target
= control target key end

     0   :  { %9 = vsyncpa [#allocation5], 0  ;;  %s2680_s0 = inlined_call_operand.hbm [shape: bf16[8,2,32], index: 0, kind: input, shape index: {}]   ;;  %s2681_s1 = inlined_call_operand.hbm [shape: bf16[32,128], index: 1, kind: input, shape index: {}]   ;;  %s2682_s2 = inlined_call_operand.hbm [shape: bf16[32,128], index: 2, kind: input, shape index: {}]   ;;  %s2683_s3 = inlined_call_operand.vmem [shape: f32[1,128], index: 3, kind: input, shape index: {}]   ;;  %s2684_s4 = inlined_call_operand.vmem [shape: bf16[2,7,32], index: 4, kind: output, shape index: {}]  }
   0x1   :  { %10 = vsyncpa [#allocation7], 0  ;;  %s2186_s15 = smov [#allocation6]   ;;  %s2116_s19 = scalar_lea.hbm %s2681_s1, 256 }
   0x2   :  { %s28_s16 = sshll.u32 %s2186_s15, 4  ;;  %p2117_p0 = scmp.ne.s32.totalorder %s2681_s1, %s2116_s19  ;;  %s29_s16 = int_to_ptr.vmem [resolvable:$true] %s28_s16 }
   0x3   :  { %p2120_p1 = scmp.lt.u32.totalorder %s2116_s19, %s2681_s1 }
   0x5   :  { %p2122_p2 = pnand %p2120_p1, %p2117_p0 }
   0x7   :  { %2125 = shalt.err (!%p2122_p2)
}
   0x8   :  { %s2126_s24 = scalar_lea.vmem %s29_s16, 256  ;;  %p2131_p4 = scmp.lt.s32.totalorder %s29_s16, %s29_s16 }
   0x9   :  { %p2127_p3 = scmp.ne.s32.totalorder %s29_s16, %s2126_s24  ;;  %p2132_p5 = scmp.lt.s32.totalorder %s2126_s24, %s2126_s24 }
   0xb   :  { %p2133_p6 = por %p2132_p5, %p2131_p4 }
   0xd   :  { %p2134_p7 = pnand %p2133_p6, %p2127_p3 }
   0xf   :  { %2137 = shalt.err (!%p2134_p7)
}
  0x10   :  { %s2187_s25 = smov 64   ;;  %s2188_s26 = smov 4  }
  0x11   :  { %34 = dma.hbm_to_vmem [thread:$0]  %s2681_s1, 256, %s29_s16, [#allocation7], %s2187_s25, %s2187_s25, %s2188_s26  }
  0x12   :  { %s2189_s29 = smov [#allocation4]   ;;  %s2138_s7 = scalar_lea.hbm %s2680_s0, 128 }
  0x13   :  { %s16_s30 = sshll.u32 %s2189_s29, 4  ;;  %p2139_p8 = scmp.ne.s32.totalorder %s2680_s0, %s2138_s7  ;;  %s17_s30 = int_to_ptr.vmem [resolvable:$true] %s16_s30 }
  0x14   :  { %p2142_p9 = scmp.lt.u32.totalorder %s2138_s7, %s2680_s0 }
  0x16   :  { %p2144_p10 = pnand %p2142_p9, %p2139_p8 }
  0x18   :  { %2147 = shalt.err (!%p2144_p10)
}
  0x19   :  { %s2148_s12 = scalar_lea.vmem %s17_s30, 128  ;;  %p2153_p12 = scmp.lt.s32.totalorder %s17_s30, %s17_s30 }
  0x1a   :  { %p2149_p11 = scmp.ne.s32.totalorder %s17_s30, %s2148_s12  ;;  %p2154_p13 = scmp.lt.s32.totalorder %s2148_s12, %s2148_s12 }
  0x1c   :  { %p2155_p0 = por %p2154_p13, %p2153_p12 }
  0x1e   :  { %p2156_p1 = pnand %p2155_p0, %p2149_p11 }
  0x20   :  { %2159 = shalt.err (!%p2156_p1)
}
  0x21   :  { %s2190_s1 = smov 16   ;;  %s2191_s13 = smov 1  }
  0x22   :  { %22 = dma.hbm_to_vmem [thread:$0]  %s2680_s0, 128, %s17_s30, [#allocation5], %s2190_s1, %s2190_s1, %s2191_s13  }
  0x23   :  { %s2192_s16 = smov [#allocation8]   ;;  %s2160_s20 = scalar_lea.hbm %s2682_s2, 256 }
  0x24   :  { %s40_s17 = sshll.u32 %s2192_s16, 4  ;;  %p2161_p2 = scmp.ne.s32.totalorder %s2682_s2, %s2160_s20  ;;  %s41_s17 = int_to_ptr.vmem [resolvable:$true] %s40_s17 }
  0x25   :  { %p2164_p3 = scmp.lt.u32.totalorder %s2160_s20, %s2682_s2 }
  0x27   :  { %p2166_p4 = pnand %p2164_p3, %p2161_p2 }
  0x29   :  { %2169 = shalt.err (!%p2166_p4)
}
  0x2a   :  { %s2170_s27 = scalar_lea.vmem %s41_s17, 256  ;;  %p2175_p6 = scmp.lt.s32.totalorder %s41_s17, %s41_s17 }
  0x2b   :  { %p2171_p5 = scmp.ne.s32.totalorder %s41_s17, %s2170_s27  ;;  %p2176_p7 = scmp.lt.s32.totalorder %s2170_s27, %s2170_s27 }
  0x2d   :  { %p2177_p8 = por %p2176_p7, %p2175_p6 }
  0x2f   :  { %p2178_p9 = pnand %p2177_p8, %p2171_p5 }
  0x31   :  { %2181 = shalt.err (!%p2178_p9)
}
  0x32   :  { %46 = dma.hbm_to_vmem [thread:$0]  %s2682_s2, 256, %s41_s17, [#allocation7], %s2187_s25, %s2187_s25, %s2188_s26  }
  0x33   :  { %2182 = dma.done.wait [#allocation5], 128  }
  0x34   :  { %2183 = vsyncadd [#allocation5], 4294967168 }
  0x35   :  { %2184 = dma.done.wait [#allocation7], 512  }
  0x36   :  { %2185 = vsyncadd [#allocation7], 4294966784  ;;  %vm59_vm0 = vcmask 254976   ;;  %v2193_v0 = vmov 0.0   ;;  %vm2194_vm1 = vmmov 0   ;;  %v2020_v1 = vld [vmem:[#allocation8] sm:$0xff]  }
  0x37   :  { %1879 = vmatprep.subr.bf16.mxu0 %v2193_v0  ;;  %1887 = vmatprep.subr.bf16.mxu1 %v2193_v0  ;;  %60 = vst.msk [vmem:[#allocation2] sm:$0x3] %vm59_vm0, %v2193_v0  ;;  %61 = vst.msk [vmem:[#allocation3] sm:$0x3] %vm59_vm0, %v2193_v0  ;;  %v2021_v2 = vld [vmem:[#allocation6] sm:$0xff]   ;;  %v2022_v3 = vld [vmem:[#allocation8 + $0x8] sm:$0xff]  }
  0x38   :  { %1883 = vmatprep.mubr.msk.bf16.mxu0 %vm2194_vm1, %v2193_v0  ;;  %1891 = vmatprep.mubr.msk.bf16.mxu1 %vm2194_vm1, %v2193_v0  ;;  %v2023_v4 = vld [vmem:[#allocation6 + $0x8] sm:$0xff]   ;;  %vm85_vm2 = vcmask 261120   ;;  %v62_v7 = vld [vmem:[#allocation4] sm:$0x1]  ;;  %s2195_s29 = smov 32   ;;  %v2024_v32 = vld [vmem:[#allocation6] sm:$0xff]  }
  0x39   :  { %1880 = vmatpush3.bf16.msra.mxu0 %v2020_v1  ;;  %1888 = vmatpush3.bf16.msra.mxu1 %v2021_v2  ;;  %v2289_v10 = vld [vmem:[%s2683_s3] ss:$0 sm:$0xff]  ;;  %s2196_s3 = smov 96   ;;  %v2025_v33 = vld [vmem:[#allocation8] sm:$0xff]   ;;  %v2027_v35 = vld [vmem:[#allocation8 + $0x8] sm:$0xff]   ;;  %vm440_vm3 = vcmask 253952  }
  0x3a   :  { %1881 = vmatprep.subr.bf16.mxu0 %v2193_v0  ;;  %1889 = vmatprep.subr.bf16.mxu1 %v2193_v0  ;;  %v2026_v34 = vld [vmem:[#allocation6 + $0x8] sm:$0xff]   ;;  %v232_v36 = vld [vmem:[#allocation4 + $0x1] sm:$0x1]  ;;  %vm441_vm4 = vsmask.f32 256  ;;  %vm875_vm6 = vcmask 254977  }
  0x3b   :  { %vm2511_vm5 = vmand %vm440_vm3, %vm441_vm4  ;;  %vm876_vm7 = vsmask.f32 1280  ;;  %vm1310_vm9 = vcmask 256002   ;;  %vm1311_vm10 = vsmask.f32 2304 }
  0x3c   :  { %vm2525_vm8 = vmand %vm875_vm6, %vm876_vm7  ;;  %vm658_vm12 = vsmask.f32 7938  ;;  %vm1093_vm14 = vsmask.f32 7942  ;;  %vm1746_vm4 = vsmask.f32 3328 }
  0x3d   :  { %1882 = vmatpush3.bf16.msra.mxu0 %v2022_v3  ;;  %1890 = vmatpush3.bf16.msra.mxu1 %v2023_v4  ;;  %v2028_v3 = vld [vmem:[#allocation6] sm:$0xff]   ;;  %v2029_v4 = vld [vmem:[#allocation8] sm:$0xff]   ;;  %vm2539_vm11 = vmand %vm1310_vm9, %vm1311_vm10 }
  0x3e   :  { %v63_v5 = vld [vmem:[#allocation2] sm:$0x3]  ;;  %1895 = vmatprep.subr.bf16.mxu0 %v2193_v0  ;;  %1903 = vmatprep.subr.bf16.mxu1 %v2193_v0  ;;  %v199_v20 = vld [vmem:[#allocation3] sm:$0x3]  ;;  %vm2554_vm13 = vmand %vm440_vm3, %vm658_vm12  ;;  %vm1745_vm3 = vcmask 257027  }
  0x3f   :  { %v64_v6 = vpack.c.bf16 %v63_v5, %v63_v5  ;;  %v2030_v5 = vld [vmem:[#allocation6 + $0x8] sm:$0xff]   ;;  %vm2570_vm15 = vmand %vm875_vm6, %vm1093_vm14 }
  0x40   :  { %1892 = vmatmul.mubr.msk.bf16.vlgmr.msra.gmra.mrb[0].mxu1 %vm85_vm2, %v62_v7  ;;  %v450_v7 = vld [vmem:[#allocation4 + $0x2] sm:$0x1] }
  0x41   :  { %1884 = vmatmul.mubr.msk.bf16.vlgmr.msra.gmra.mrb[0].mxu0 %vm85_vm2, %v64_v6  ;;  %1907 = vmatprep.mubr.msk.bf16.mxu1 %vm2194_vm1, %v2193_v0  ;;  %v2031_v6 = vld [vmem:[#allocation8 + $0x8] sm:$0xff]  }
  0x42   :  { %1899 = vmatprep.mubr.msk.bf16.mxu0 %vm2194_vm1, %v2193_v0  ;;  %1904 = vmatpush3.bf16.msra.mxu1 %v2024_v32 }
  0x43   :  { %1905 = vmatprep.subr.bf16.mxu1 %v2193_v0  ;;  %1896 = vmatpush3.bf16.msra.mxu0 %v2025_v33 }
  0x44   :  { %1897 = vmatprep.subr.bf16.mxu0 %v2193_v0 }
  0x46   :  { %1906 = vmatpush3.bf16.msra.mxu1 %v2026_v34 }
  0x47   :  { %1919 = vmatprep.subr.bf16.mxu1 %v2193_v0  ;;  %1898 = vmatpush3.bf16.msra.mxu0 %v2027_v35 }
  0x48   :  { %1911 = vmatprep.subr.bf16.mxu0 %v2193_v0 }
  0x49   :  { %1908 = vmatmul.mubr.msk.bf16.vlgmr.msra.gmra.mrb[4].mxu1 %vm85_vm2, %v232_v36 }
  0x4a   :  { %1923 = vmatprep.mubr.msk.bf16.mxu1 %vm2194_vm1, %v2193_v0  ;;  %1920 = vmatpush3.bf16.msra.mxu1 %v2028_v3 }
  0x4b   :  { %1921 = vmatprep.subr.bf16.mxu1 %v2193_v0 }
  0x4e   :  { %1922 = vmatpush3.bf16.msra.mxu1 %v2030_v5 }
  0x4f   :  { %1935 = vmatprep.subr.bf16.mxu1 %v2193_v0 }
  0x51   :  { %1924 = vmatmul.mubr.msk.bf16.vlgmr.msra.gmra.mrb[8].mxu1 %vm85_vm2, %v450_v7 }
  0x52   :  { %1939 = vmatprep.mubr.msk.bf16.mxu1 %vm2194_vm1, %v2193_v0 }
 0x113   :  { %v178_v9 = vpop.f32.mrb[0].mxu1 }
 0x114   :  { %v123_v8 = vpop.f32.mrb[0].mxu0  ;;  %v1893_v13 = vpop.f32.mrb[1].mxu1 }
 0x115   :  { %v1885_v11 = vpop.f32.mrb[1].mxu0  ;;  %v179_v12 = vadd.f32 %v178_v9, %v123_v8  ;;  %v181_v15 = vpop.f32.mrb[2].mxu1 }
 0x116   :  { %v126_v14 = vpop.f32.mrb[2].mxu0  ;;  %v1894_v18 = vpop.f32.mrb[3].mxu1 }
 0x117   :  { %v1886_v16 = vpop.f32.mrb[3].mxu0  ;;  %v191_v17 = vadd.f32 %v2289_v10, %v179_v12 }
 0x119   :  { %2052 = vtanh.f32 %v191_v17  ;;  %v1767_v21 = vmul.f32 -1.442695, %v191_v17 }
 0x11b   :  { %2054 = vpow2.f32 %v1767_v21 }
 0x11c   :  { %v347_v44 = vpop.f32.mrb[4].mxu1 }
 0x11d   :  { %v1909_v45 = vpop.f32.mrb[5].mxu1 }
 0x11e   :  { %v350_v46 = vpop.f32.mrb[6].mxu1 }
 0x11f   :  { %v1910_v47 = vpop.f32.mrb[7].mxu1 }
 0x123   :  { %v2053_v19 = vpop.eup %2052 }
 0x124   :  { %206 = vrot.lane.b32.xlu0 %v2053_v19, %s2195_s29  ;;  %v565_v16 = vpop.f32.mrb[8].mxu1 }
 0x125   :  { %v2055_v22 = vpop.eup %2054  ;;  %v1925_v17 = vpop.f32.mrb[9].mxu1 }
 0x126   :  { %v195_v23 = vadd.f32 1.0, %v2055_v22  ;;  %v568_v18 = vpop.f32.mrb[10].mxu1 }
 0x127   :  { %v1926_v19 = vpop.f32.mrb[11].mxu1 }
 0x128   :  { %201 = vrot.lane.b32.xlu0 %v199_v20, %s2195_s29  ;;  %2056 = vrcp.f32 %v195_v23 }
 0x132   :  { %v2057_v24 = vpop.eup %2056 }
 0x196   :  { %v207_v25 = vpop.permute.xlu0 %206 }
 0x197   :  { %v209_v26 = vmul.f32 %v2057_v24, %v207_v25 }
 0x199   :  { %211 = vrot.lane.b32.xlu1 %v209_v26, %s2195_s29 }
 0x19a   :  { %v202_v27 = vpop.permute.xlu0 %201 }
 0x19b   :  { %v204_v28 = vmul.f32 %v2057_v24, %v202_v27 }
 0x20b   :  { %v212_v29 = vpop.permute.xlu1 %211 }
 0x20c   :  { %v214_v30 = vadd.f32 %v212_v29, %v204_v28 }
 0x20e   :  { %2058 = vtanh.f32 %v214_v30 }
 0x218   :  { %v2059_v31 = vpop.eup %2058 }
 0x219   :  { %217 = vrot.lane.b32.xlu1 %v2059_v31, %s2195_s29 }
 0x21d   :  { %222 = vrot.lane.b32.xlu1 %v214_v30, %s2196_s3 }
 0x28b   :  { %v218_v37 = vpop.permute.xlu1 %217 }
 0x28c   :  { %v220_v38 = vmul.f32 %v2057_v24, %v218_v37 }
 0x28e   :  { %227 = vrot.lane.b32.xlu0 %v220_v38, %s2187_s25  ;;  %v2032_v38 = vld [vmem:[#allocation6] sm:$0xff]  }
 0x28f   :  { %v223_v39 = vpop.permute.xlu1 %222  ;;  %1936 = vmatpush3.bf16.msra.mxu1 %v2032_v38 }
 0x290   :  { %225 = vst.msk [vmem:[#allocation3] sm:$0x3] %vm59_vm0, %v223_v39  ;;  %v2033_v39 = vld [vmem:[#allocation8] sm:$0xff]   ;;  %1937 = vmatprep.subr.bf16.mxu1 %v2193_v0 }
 0x297   :  { %v368_v40 = vld [vmem:[#allocation3] sm:$0x3] }
 0x298   :  { %370 = vrot.lane.b32.xlu1 %v368_v40, %s2195_s29  ;;  %v2034_v40 = vld [vmem:[#allocation6 + $0x8] sm:$0xff]  }
 0x299   :  { %1938 = vmatpush3.bf16.msra.mxu1 %v2034_v40 }
 0x29a   :  { %1951 = vmatprep.subr.bf16.mxu1 %v2193_v0 }
 0x300   :  { %v228_v41 = vpop.permute.xlu0 %227 }
 0x301   :  { %230 = vst.msk [vmem:[#allocation2] sm:$0x3] %vm59_vm0, %v228_v41  ;;  %v2035_v41 = vld [vmem:[#allocation8 + $0x8] sm:$0xff]  }
 0x308   :  { %v233_v42 = vld [vmem:[#allocation2] sm:$0x3] }
 0x309   :  { %v234_v43 = vpack.c.bf16 %v233_v42, %v233_v42  ;;  %v667_v42 = vld [vmem:[#allocation4 + $0x3] sm:$0x1] }
 0x30a   :  { %v371_v61 = vpop.permute.xlu1 %370  ;;  %1940 = vmatmul.mubr.msk.bf16.vlgmr.msra.gmra.mrb[12].mxu1 %vm85_vm2, %v667_v42 }
 0x30b   :  { %1900 = vmatmul.mubr.msk.bf16.vlgmr.msra.gmra.mrb[4].mxu0 %vm85_vm2, %v234_v43  ;;  %1955 = vmatprep.mubr.msk.bf16.mxu1 %vm2194_vm1, %v2193_v0 }
 0x30c   :  { %1915 = vmatprep.mubr.msk.bf16.mxu0 %vm2194_vm1, %v2193_v0  ;;  %1912 = vmatpush3.bf16.msra.mxu0 %v2029_v4 }
 0x30d   :  { %1913 = vmatprep.subr.bf16.mxu0 %v2193_v0 }
 0x310   :  { %1914 = vmatpush3.bf16.msra.mxu0 %v2031_v6 }
 0x311   :  { %1927 = vmatprep.subr.bf16.mxu0 %v2193_v0 }
 0x3de   :  { %v292_v48 = vpop.f32.mrb[4].mxu0 }
 0x3df   :  { %v348_v49 = vadd.f32 %v347_v44, %v292_v48  ;;  %v1901_v50 = vpop.f32.mrb[5].mxu0 }
 0x3e0   :  { %v295_v51 = vpop.f32.mrb[6].mxu0  ;;  %v782_v50 = vpop.f32.mrb[12].mxu1 }
 0x3e1   :  { %v360_v52 = vadd.f32 %v2289_v10, %v348_v49  ;;  %v1902_v53 = vpop.f32.mrb[7].mxu0  ;;  %v1941_v51 = vpop.f32.mrb[13].mxu1 }
 0x3e3   :  { %2060 = vtanh.f32 %v360_v52  ;;  %v1775_v55 = vmul.f32 -1.442695, %v360_v52  ;;  %v785_v52 = vpop.f32.mrb[14].mxu1 }
 0x3e4   :  { %v1942_v53 = vpop.f32.mrb[15].mxu1 }
 0x3e5   :  { %2062 = vpow2.f32 %v1775_v55 }
 0x3ed   :  { %v2061_v54 = vpop.eup %2060 }
 0x3ee   :  { %375 = vrot.lane.b32.xlu0 %v2061_v54, %s2195_s29 }
 0x3ef   :  { %v2063_v56 = vpop.eup %2062 }
 0x3f0   :  { %v364_v57 = vadd.f32 1.0, %v2063_v56 }
 0x3f2   :  { %2064 = vrcp.f32 %v364_v57 }
 0x3fc   :  { %v2065_v58 = vpop.eup %2064 }
 0x3fd   :  { %v373_v62 = vmul.f32 %v2065_v58, %v371_v61 }
 0x460   :  { %v376_v59 = vpop.permute.xlu0 %375 }
 0x461   :  { %v378_v60 = vmul.f32 %v2065_v58, %v376_v59 }
 0x463   :  { %380 = vrot.lane.b32.xlu0 %v378_v60, %s2195_s29 }
 0x4d5   :  { %v381_v63 = vpop.permute.xlu0 %380 }
 0x4d6   :  { %v383_v1 = vadd.f32 %v381_v63, %v373_v62 }
 0x4d8   :  { %2066 = vtanh.f32 %v383_v1 }
 0x4e2   :  { %v2067_v2 = vpop.eup %2066 }
 0x4e3   :  { %386 = vrot.lane.b32.xlu1 %v2067_v2, %s2195_s29 }
 0x4e7   :  { %391 = vrot.lane.b32.xlu1 %v383_v1, %s2196_s3 }
 0x555   :  { %v387_v8 = vpop.permute.xlu1 %386 }
 0x556   :  { %v2323_v9 = vmul.f32 %v2065_v58, %v387_v8 }
 0x558   :  { %396 = vrot.lane.b32.xlu0 %v2323_v9, %s2187_s25 }
 0x559   :  { %v392_v11 = vpop.permute.xlu1 %391 }
 0x55a   :  { %394 = vst.msk [vmem:[#allocation3] sm:$0x3] %vm59_vm0, %v392_v11  ;;  %v2036_v11 = vld [vmem:[#allocation6] sm:$0xff]  }
 0x55b   :  { %1952 = vmatpush3.bf16.msra.mxu1 %v2036_v11 }
 0x55c   :  { %1953 = vmatprep.subr.bf16.mxu1 %v2193_v0 }
 0x561   :  { %v586_v12 = vld [vmem:[#allocation3] sm:$0x3] }
 0x562   :  { %588 = vrot.lane.b32.xlu1 %v586_v12, %s2195_s29  ;;  %v2037_v12 = vld [vmem:[#allocation8] sm:$0xff]  }
 0x5ca   :  { %v397_v13 = vpop.permute.xlu0 %396 }
 0x5cb   :  { %399 = vst.msk [vmem:[#allocation2] sm:$0x3] %vm59_vm0, %v397_v13  ;;  %v2038_v13 = vld [vmem:[#allocation6 + $0x8] sm:$0xff]  }
 0x5cc   :  { %1954 = vmatpush3.bf16.msra.mxu1 %v2038_v13 }
 0x5cd   :  { %1967 = vmatprep.subr.bf16.mxu1 %v2193_v0 }
 0x5d2   :  { %v451_v14 = vld [vmem:[#allocation2] sm:$0x3] }
 0x5d3   :  { %v452_v15 = vpack.c.bf16 %v451_v14, %v451_v14  ;;  %v2039_v14 = vld [vmem:[#allocation8 + $0x8] sm:$0xff]  }
 0x5d4   :  { %v589_v33 = vpop.permute.xlu1 %588 }
 0x5d5   :  { %1916 = vmatmul.mubr.msk.bf16.vlgmr.msra.gmra.mrb[8].mxu0 %vm85_vm2, %v452_v15  ;;  %v885_v15 = vld [vmem:[#allocation4 + $0x4] sm:$0x1] }
 0x5d6   :  { %1931 = vmatprep.mubr.msk.bf16.mxu0 %vm2194_vm1, %v2193_v0  ;;  %1928 = vmatpush3.bf16.msra.mxu0 %v2033_v39 }
 0x5d7   :  { %1929 = vmatprep.subr.bf16.mxu0 %v2193_v0  ;;  %1956 = vmatmul.mubr.msk.bf16.vlgmr.msra.gmra.mrb[16].mxu1 %vm85_vm2, %v885_v15 }
 0x5d8   :  { %1971 = vmatprep.mubr.msk.bf16.mxu1 %vm2194_vm1, %v2193_v0 }
 0x5da   :  { %1930 = vmatpush3.bf16.msra.mxu0 %v2035_v41 }
 0x5db   :  { %1943 = vmatprep.subr.bf16.mxu0 %v2193_v0 }
 0x6a8   :  { %v510_v20 = vpop.f32.mrb[8].mxu0 }
 0x6a9   :  { %v566_v21 = vadd.f32 %v565_v16, %v510_v20  ;;  %v1917_v22 = vpop.f32.mrb[9].mxu0 }
 0x6aa   :  { %v513_v23 = vpop.f32.mrb[10].mxu0 }
 0x6ab   :  { %v578_v24 = vadd.f32 %v2289_v10, %v566_v21  ;;  %v1918_v25 = vpop.f32.mrb[11].mxu0  ;;  %v1000_v23 = vpop.f32.mrb[16].mxu1 }
 0x6ad   :  { %2068 = vtanh.f32 %v578_v24  ;;  %v1784_v27 = vmul.f32 -1.442695, %v578_v24  ;;  %v1957_v24 = vpop.f32.mrb[17].mxu1 }
 0x6ae   :  { %v1003_v25 = vpop.f32.mrb[18].mxu1  ;;  %v1320_v24 = vld [vmem:[#allocation4 + $0x6] sm:$0x1] }
 0x6af   :  { %2070 = vpow2.f32 %v1784_v27 }
 0x6b7   :  { %v2069_v26 = vpop.eup %2068 }
 0x6b8   :  { %593 = vrot.lane.b32.xlu0 %v2069_v26, %s2195_s29  ;;  %v1958_v26 = vpop.f32.mrb[19].mxu1 }
 0x6b9   :  { %v2071_v28 = vpop.eup %2070 }
 0x6ba   :  { %v582_v29 = vadd.f32 1.0, %v2071_v28 }
 0x6bc   :  { %2072 = vrcp.f32 %v582_v29 }
 0x6c6   :  { %v2073_v30 = vpop.eup %2072 }
 0x6c7   :  { %v591_v34 = vmul.f32 %v2073_v30, %v589_v33 }
 0x72a   :  { %v594_v31 = vpop.permute.xlu0 %593 }
 0x72b   :  { %v596_v32 = vmul.f32 %v2073_v30, %v594_v31 }
 0x72d   :  { %598 = vrot.lane.b32.xlu0 %v596_v32, %s2195_s29 }
 0x79f   :  { %v599_v35 = vpop.permute.xlu0 %598 }
 0x7a0   :  { %v601_v36 = vadd.f32 %v599_v35, %v591_v34 }
 0x7a2   :  { %2074 = vtanh.f32 %v601_v36 }
 0x7ac   :  { %v2075_v37 = vpop.eup %2074 }
 0x7ad   :  { %604 = vrot.lane.b32.xlu1 %v2075_v37, %s2195_s29 }
 0x7b1   :  { %609 = vrot.lane.b32.xlu1 %v601_v36, %s2196_s3 }
 0x81f   :  { %v605_v43 = vpop.permute.xlu1 %604 }
 0x820   :  { %v2345_v44 = vmul.f32 %v2073_v30, %v605_v43 }
 0x822   :  { %614 = vrot.lane.b32.xlu0 %v2345_v44, %s2187_s25 }
 0x823   :  { %v610_v45 = vpop.permute.xlu1 %609 }
 0x824   :  { %612 = vst.msk [vmem:[#allocation3] sm:$0x3] %vm59_vm0, %v610_v45 }
 0x82b   :  { %v803_v46 = vld [vmem:[#allocation3] sm:$0x3] }
 0x82c   :  { %805 = vrot.lane.b32.xlu1 %v803_v46, %s2195_s29  ;;  %v2040_v46 = vld [vmem:[#allocation6] sm:$0xff]  }
 0x82d   :  { %1968 = vmatpush3.bf16.msra.mxu1 %v2040_v46 }
 0x82e   :  { %1969 = vmatprep.subr.bf16.mxu1 %v2193_v0 }
 0x894   :  { %v615_v47 = vpop.permute.xlu0 %614 }
 0x895   :  { %617 = vst.msk [vmem:[#allocation2] sm:$0x3] %vm59_vm0, %v615_v47  ;;  %v2041_v47 = vld [vmem:[#allocation8] sm:$0xff]  }
 0x89c   :  { %v668_v48 = vld [vmem:[#allocation2] sm:$0x3] }
 0x89d   :  { %v669_v49 = vpack.c.bf16 %v668_v48, %v668_v48  ;;  %v2042_v48 = vld [vmem:[#allocation6 + $0x8] sm:$0xff]  }
 0x89e   :  { %v806_v4 = vpop.permute.xlu1 %805  ;;  %1970 = vmatpush3.bf16.msra.mxu1 %v2042_v48 }
 0x89f   :  { %1932 = vmatmul.mubr.msk.bf16.vlgmr.msra.gmra.mrb[12].mxu0 %vm85_vm2, %v669_v49  ;;  %v2043_v49 = vld [vmem:[#allocation8 + $0x8] sm:$0xff]   ;;  %1983 = vmatprep.subr.bf16.mxu1 %v2193_v0 }
 0x8a0   :  { %1947 = vmatprep.mubr.msk.bf16.mxu0 %vm2194_vm1, %v2193_v0  ;;  %1944 = vmatpush3.bf16.msra.mxu0 %v2037_v12 }
 0x8a1   :  { %1945 = vmatprep.subr.bf16.mxu0 %v2193_v0 }
 0x8a4   :  { %1946 = vmatpush3.bf16.msra.mxu0 %v2039_v14 }
 0x8a5   :  { %1959 = vmatprep.subr.bf16.mxu0 %v2193_v0 }
 0x972   :  { %v727_v54 = vpop.f32.mrb[12].mxu0 }
 0x973   :  { %v783_v55 = vadd.f32 %v782_v50, %v727_v54  ;;  %v1933_v56 = vpop.f32.mrb[13].mxu0  ;;  %v1102_v50 = vld [vmem:[#allocation4 + $0x5] sm:$0x1] }
 0x974   :  { %v730_v57 = vpop.f32.mrb[14].mxu0  ;;  %1972 = vmatmul.mubr.msk.bf16.vlgmr.msra.gmra.mrb[20].mxu1 %vm85_vm2, %v1102_v50 }
 0x975   :  { %v795_v58 = vadd.f32 %v2289_v10, %v783_v55  ;;  %v1934_v59 = vpop.f32.mrb[15].mxu0  ;;  %1987 = vmatprep.mubr.msk.bf16.mxu1 %vm2194_vm1, %v2193_v0 }
 0x977   :  { %2076 = vtanh.f32 %v795_v58  ;;  %v1793_v61 = vmul.f32 -1.442695, %v795_v58 }
 0x979   :  { %2078 = vpow2.f32 %v1793_v61 }
 0x981   :  { %v2077_v60 = vpop.eup %2076 }
 0x982   :  { %810 = vrot.lane.b32.xlu0 %v2077_v60, %s2195_s29 }
 0x983   :  { %v2079_v62 = vpop.eup %2078 }
 0x984   :  { %v799_v63 = vadd.f32 1.0, %v2079_v62 }
 0x986   :  { %2080 = vrcp.f32 %v799_v63 }
 0x990   :  { %v2081_v1 = vpop.eup %2080 }
 0x991   :  { %v808_v5 = vmul.f32 %v2081_v1, %v806_v4 }
 0x9f4   :  { %v811_v2 = vpop.permute.xlu0 %810 }
 0x9f5   :  { %v813_v3 = vmul.f32 %v2081_v1, %v811_v2 }
 0x9f7   :  { %815 = vrot.lane.b32.xlu0 %v813_v3, %s2195_s29 }
 0xa47   :  { %v1217_v58 = vpop.f32.mrb[20].mxu1 }
 0xa48   :  { %v1973_v59 = vpop.f32.mrb[21].mxu1 }
 0xa49   :  { %v1220_v60 = vpop.f32.mrb[22].mxu1  ;;  %v2051_v59 = vld [vmem:[#allocation8 + $0x8] sm:$0xff]  }
 0xa4a   :  { %v1974_v61 = vpop.f32.mrb[23].mxu1  ;;  %v1537_v60 = vld [vmem:[#allocation4 + $0x7] sm:$0x1] }
 0xa69   :  { %v816_v6 = vpop.permute.xlu0 %815 }
 0xa6a   :  { %v818_v7 = vadd.f32 %v816_v6, %v808_v5 }
 0xa6c   :  { %2082 = vtanh.f32 %v818_v7 }
 0xa76   :  { %v2083_v8 = vpop.eup %2082 }
 0xa77   :  { %821 = vrot.lane.b32.xlu1 %v2083_v8, %s2195_s29 }
 0xa7b   :  { %826 = vrot.lane.b32.xlu1 %v818_v7, %s2196_s3 }
 0xae9   :  { %v822_v16 = vpop.permute.xlu1 %821 }
 0xaea   :  { %v2367_v17 = vmul.f32 %v2081_v1, %v822_v16 }
 0xaec   :  { %831 = vrot.lane.b32.xlu0 %v2367_v17, %s2187_s25 }
 0xaed   :  { %v827_v18 = vpop.permute.xlu1 %826 }
 0xaee   :  { %829 = vst.msk [vmem:[#allocation3] sm:$0x3] %vm59_vm0, %v827_v18 }
 0xaf5   :  { %v1021_v19 = vld [vmem:[#allocation3] sm:$0x3] }
 0xaf6   :  { %1023 = vrot.lane.b32.xlu1 %v1021_v19, %s2195_s29 }
 0xb5e   :  { %v832_v20 = vpop.permute.xlu0 %831 }
 0xb5f   :  { %834 = vst.msk [vmem:[#allocation2] sm:$0x3] %vm59_vm0, %v832_v20  ;;  %v2044_v20 = vld [vmem:[#allocation6] sm:$0xff]  }
 0xb60   :  { %1984 = vmatpush3.bf16.msra.mxu1 %v2044_v20 }
 0xb61   :  { %1985 = vmatprep.subr.bf16.mxu1 %v2193_v0 }
 0xb66   :  { %v886_v21 = vld [vmem:[#allocation2] sm:$0x3] }
 0xb67   :  { %v887_v22 = vpack.c.bf16 %v886_v21, %v886_v21  ;;  %v2045_v21 = vld [vmem:[#allocation8] sm:$0xff]  }
 0xb68   :  { %v1024_v40 = vpop.permute.xlu1 %1023 }
 0xb69   :  { %1948 = vmatmul.mubr.msk.bf16.vlgmr.msra.gmra.mrb[16].mxu0 %vm85_vm2, %v887_v22  ;;  %v2046_v22 = vld [vmem:[#allocation6 + $0x8] sm:$0xff]  }
 0xb6a   :  { %1963 = vmatprep.mubr.msk.bf16.mxu0 %vm2194_vm1, %v2193_v0  ;;  %1960 = vmatpush3.bf16.msra.mxu0 %v2041_v47 }
 0xb6b   :  { %1961 = vmatprep.subr.bf16.mxu0 %v2193_v0  ;;  %1986 = vmatpush3.bf16.msra.mxu1 %v2046_v22 }
 0xb6c   :  { %1999 = vmatprep.subr.bf16.mxu1 %v2193_v0 }
 0xb6e   :  { %1962 = vmatpush3.bf16.msra.mxu0 %v2043_v49  ;;  %1988 = vmatmul.mubr.msk.bf16.vlgmr.msra.gmra.mrb[24].mxu1 %vm85_vm2, %v1320_v24 }
 0xb6f   :  { %1975 = vmatprep.subr.bf16.mxu0 %v2193_v0  ;;  %2003 = vmatprep.mubr.msk.bf16.mxu1 %vm2194_vm1, %v2193_v0 }
 0xc3c   :  { %v945_v27 = vpop.f32.mrb[16].mxu0 }
 0xc3d   :  { %v1001_v28 = vadd.f32 %v1000_v23, %v945_v27  ;;  %v1949_v29 = vpop.f32.mrb[17].mxu0  ;;  %v2047_v23 = vld [vmem:[#allocation8 + $0x8] sm:$0xff]  }
 0xc3e   :  { %v948_v30 = vpop.f32.mrb[18].mxu0 }
 0xc3f   :  { %v1013_v31 = vadd.f32 %v2289_v10, %v1001_v28  ;;  %v1950_v32 = vpop.f32.mrb[19].mxu0 }
 0xc41   :  { %2084 = vtanh.f32 %v1013_v31  ;;  %v1802_v34 = vmul.f32 -1.442695, %v1013_v31  ;;  %v1435_v32 = vpop.f32.mrb[24].mxu1 }
 0xc43   :  { %2086 = vpow2.f32 %v1802_v34 }
 0xc4b   :  { %v2085_v33 = vpop.eup %2084 }
 0xc4c   :  { %1028 = vrot.lane.b32.xlu0 %v2085_v33, %s2195_s29  ;;  %v1989_v33 = vpop.f32.mrb[25].mxu1 }
 0xc4d   :  { %v2087_v35 = vpop.eup %2086  ;;  %v1438_v34 = vpop.f32.mrb[26].mxu1 }
 0xc4e   :  { %v1017_v36 = vadd.f32 1.0, %v2087_v35  ;;  %v1990_v35 = vpop.f32.mrb[27].mxu1 }
 0xc50   :  { %2088 = vrcp.f32 %v1017_v36 }
 0xc5a   :  { %v2089_v37 = vpop.eup %2088 }
 0xc5b   :  { %v1026_v41 = vmul.f32 %v2089_v37, %v1024_v40 }
 0xcbe   :  { %v1029_v38 = vpop.permute.xlu0 %1028 }
 0xcbf   :  { %v1031_v39 = vmul.f32 %v2089_v37, %v1029_v38 }
 0xcc1   :  { %1033 = vrot.lane.b32.xlu0 %v1031_v39, %s2195_s29 }
 0xd33   :  { %v1034_v42 = vpop.permute.xlu0 %1033 }
 0xd34   :  { %v1036_v43 = vadd.f32 %v1034_v42, %v1026_v41 }
 0xd36   :  { %2090 = vtanh.f32 %v1036_v43 }
 0xd40   :  { %v2091_v45 = vpop.eup %2090 }
 0xd41   :  { %1039 = vrot.lane.b32.xlu1 %v2091_v45, %s2195_s29 }
 0xd45   :  { %1044 = vrot.lane.b32.xlu1 %v1036_v43, %s2196_s3 }
 0xdb3   :  { %v1040_v51 = vpop.permute.xlu1 %1039 }
 0xdb4   :  { %v2389_v52 = vmul.f32 %v2089_v37, %v1040_v51 }
 0xdb6   :  { %1049 = vrot.lane.b32.xlu0 %v2389_v52, %s2187_s25 }
 0xdb7   :  { %v1045_v53 = vpop.permute.xlu1 %1044 }
 0xdb8   :  { %1047 = vst.msk [vmem:[#allocation3] sm:$0x3] %vm59_vm0, %v1045_v53 }
 0xdbf   :  { %v1238_v54 = vld [vmem:[#allocation3] sm:$0x3] }
 0xdc0   :  { %1240 = vrot.lane.b32.xlu1 %v1238_v54, %s2195_s29 }
 0xe28   :  { %v1050_v55 = vpop.permute.xlu0 %1049 }
 0xe29   :  { %1052 = vst.msk [vmem:[#allocation2] sm:$0x3] %vm59_vm0, %v1050_v55 }
 0xe30   :  { %v1103_v56 = vld [vmem:[#allocation2] sm:$0x3] }
 0xe31   :  { %v1104_v57 = vpack.c.bf16 %v1103_v56, %v1103_v56  ;;  %v2048_v56 = vld [vmem:[#allocation6] sm:$0xff]  }
 0xe32   :  { %v1241_v14 = vpop.permute.xlu1 %1240  ;;  %2000 = vmatpush3.bf16.msra.mxu1 %v2048_v56 }
 0xe33   :  { %1964 = vmatmul.mubr.msk.bf16.vlgmr.msra.gmra.mrb[20].mxu0 %vm85_vm2, %v1104_v57  ;;  %v2049_v57 = vld [vmem:[#allocation8] sm:$0xff]   ;;  %2001 = vmatprep.subr.bf16.mxu1 %v2193_v0 }
 0xe34   :  { %1979 = vmatprep.mubr.msk.bf16.mxu0 %vm2194_vm1, %v2193_v0  ;;  %1976 = vmatpush3.bf16.msra.mxu0 %v2045_v21  ;;  %v405_v21 = vlaneseq }
 0xe35   :  { %1977 = vmatprep.subr.bf16.mxu0 %v2193_v0 }
 0xe36   :  { %v406_v24 = vshrl.u32 %v405_v21, 7 }
 0xe38   :  { %1978 = vmatpush3.bf16.msra.mxu0 %v2047_v23 }
 0xe39   :  { %1991 = vmatprep.subr.bf16.mxu0 %v2193_v0 }
 0xf06   :  { %v1162_v62 = vpop.f32.mrb[20].mxu0 }
 0xf07   :  { %v1218_v63 = vadd.f32 %v1217_v58, %v1162_v62  ;;  %v1965_v1 = vpop.f32.mrb[21].mxu0  ;;  %v2050_v58 = vld [vmem:[#allocation6 + $0x8] sm:$0xff]  }
 0xf08   :  { %v1165_v2 = vpop.f32.mrb[22].mxu0  ;;  %2002 = vmatpush3.bf16.msra.mxu1 %v2050_v58 }
 0xf09   :  { %v1230_v3 = vadd.f32 %v2289_v10, %v1218_v63  ;;  %v1966_v4 = vpop.f32.mrb[23].mxu0 }
 0xf0b   :  { %2092 = vtanh.f32 %v1230_v3  ;;  %v1811_v6 = vmul.f32 -1.442695, %v1230_v3  ;;  %2004 = vmatmul.mubr.msk.bf16.vlgmr.msra.gmra.mrb[28].mxu1 %vm85_vm2, %v1537_v60 }
 0xf0d   :  { %2094 = vpow2.f32 %v1811_v6 }
 0xf15   :  { %v2093_v5 = vpop.eup %2092 }
 0xf16   :  { %1245 = vrot.lane.b32.xlu0 %v2093_v5, %s2195_s29 }
 0xf17   :  { %v2095_v7 = vpop.eup %2094 }
 0xf18   :  { %v1234_v8 = vadd.f32 1.0, %v2095_v7 }
 0xf1a   :  { %2096 = vrcp.f32 %v1234_v8 }
 0xf24   :  { %v2097_v11 = vpop.eup %2096 }
 0xf25   :  { %v1243_v15 = vmul.f32 %v2097_v11, %v1241_v14 }
 0xf88   :  { %v1246_v12 = vpop.permute.xlu0 %1245 }
 0xf89   :  { %v1248_v13 = vmul.f32 %v2097_v11, %v1246_v12 }
 0xf8b   :  { %1250 = vrot.lane.b32.xlu0 %v1248_v13, %s2195_s29 }
 0xfde   :  { %v1652_v4 = vpop.f32.mrb[28].mxu1 }
 0xfdf   :  { %v2005_v5 = vpop.f32.mrb[29].mxu1 }
 0xfe0   :  { %v1655_v6 = vpop.f32.mrb[30].mxu1 }
 0xfe1   :  { %v2006_v7 = vpop.f32.mrb[31].mxu1  ;;  %v878_v6 = vld [vmem:[%s2684_s4] sm:$0x2] }
 0xffd   :  { %v1251_v16 = vpop.permute.xlu0 %1250 }
 0xffe   :  { %v1253_v18 = vadd.f32 %v1251_v16, %v1243_v15 }
0x1000   :  { %2098 = vtanh.f32 %v1253_v18 }
0x100a   :  { %v2099_v19 = vpop.eup %2098 }
0x100b   :  { %1256 = vrot.lane.b32.xlu1 %v2099_v19, %s2195_s29  ;;  %v2197_v19 = vmov 1966171168  }
0x100c   :  { %v403_v20 = vunpack.c.l.s4 %v2197_v19 }
0x100e   :  { %v404_v23 = vunpack.c.0.s8 %v403_v20 }
0x100f   :  { %1261 = vrot.lane.b32.xlu1 %v1253_v18, %s2196_s3 }
0x107d   :  { %v1257_v25 = vpop.permute.xlu1 %1256 }
0x107e   :  { %v2411_v26 = vmul.f32 %v2097_v11, %v1257_v25 }
0x1080   :  { %1266 = vrot.lane.b32.xlu0 %v2411_v26, %s2187_s25  ;;  %v1270_v34 = vpack.c.bf16 %v2411_v26, %v2411_v26 }
0x1081   :  { %v1262_v27 = vpop.permute.xlu1 %1261 }
0x1082   :  { %1264 = vst.msk [vmem:[#allocation3] sm:$0x3] %vm59_vm0, %v1262_v27  ;;  %v2439_v27 = vsub.s32 %v404_v23, %v406_v24 }
0x1089   :  { %v1456_v28 = vld [vmem:[#allocation3] sm:$0x3] }
0x108a   :  { %1458 = vrot.lane.b32.xlu1 %v1456_v28, %s2195_s29  ;;  %v400_v28 = vpack.c.bf16 %v2323_v9, %v2323_v9  ;;  %v618_v9 = vpack.c.bf16 %v2345_v44, %v2345_v44  ;;  %v1053_v44 = vpack.c.bf16 %v2389_v52, %v2389_v52 }
0x10f2   :  { %v1267_v29 = vpop.permute.xlu0 %1266 }
0x10f3   :  { %1269 = vst.msk [vmem:[#allocation2] sm:$0x3] %vm59_vm0, %v1267_v29 }
0x10fa   :  { %v1321_v30 = vld [vmem:[#allocation2] sm:$0x3] }
0x10fb   :  { %v1322_v31 = vpack.c.bf16 %v1321_v30, %v1321_v30  ;;  %v408_v30 = vrot.slane %v400_v28, %v2439_v27 }
0x10fc   :  { %v1459_v50 = vpop.permute.xlu1 %1458 }
0x10fd   :  { %1980 = vmatmul.mubr.msk.bf16.vlgmr.msra.gmra.mrb[24].mxu0 %vm85_vm2, %v1322_v31  ;;  %v835_v31 = vpack.c.bf16 %v2367_v17, %v2367_v17  ;;  %v2450_v35 = vrot.slane %v408_v30, %v2439_v27 }
0x10fe   :  { %1995 = vmatprep.mubr.msk.bf16.mxu0 %vm2194_vm1, %v2193_v0  ;;  %1992 = vmatpush3.bf16.msra.mxu0 %v2049_v57  ;;  %vm1528_vm1 = vsmask.f32 7946 }
0x10ff   :  { %1993 = vmatprep.subr.bf16.mxu0 %v2193_v0  ;;  %v843_v33 = vrot.slane %v835_v31, %v2439_v27 }
0x1101   :  { %v2463_v26 = vrot.slane %v843_v33, %v2439_v27 }
0x1102   :  { %1994 = vmatpush3.bf16.msra.mxu0 %v2051_v59 }
0x11d0   :  { %v1380_v36 = vpop.f32.mrb[24].mxu0 }
0x11d1   :  { %v1436_v37 = vadd.f32 %v1435_v32, %v1380_v36  ;;  %v1981_v38 = vpop.f32.mrb[25].mxu0 }
0x11d2   :  { %v1383_v39 = vpop.f32.mrb[26].mxu0 }
0x11d3   :  { %v1448_v40 = vadd.f32 %v2289_v10, %v1436_v37  ;;  %v1982_v41 = vpop.f32.mrb[27].mxu0  ;;  %v1278_v39 = vrot.slane %v1270_v34, %v2439_v27 }
0x11d4   :  { %v626_v41 = vrot.slane %v618_v9, %v2439_v27 }
0x11d5   :  { %2100 = vtanh.f32 %v1448_v40  ;;  %v1820_v43 = vmul.f32 -1.442695, %v1448_v40  ;;  %v1776_v40 = vpack.i.b16 %v2450_v35, %v2450_v35 }
0x11d7   :  { %2102 = vpow2.f32 %v1820_v43  ;;  %v1794_v43 = vpack.i.b16 %v2463_v26, %v2463_v26 }
0x11df   :  { %v2101_v42 = vpop.eup %2100 }
0x11e0   :  { %1463 = vrot.lane.b32.xlu0 %v2101_v42, %s2195_s29 }
0x11e1   :  { %v2103_v45 = vpop.eup %2102 }
0x11e2   :  { %v1452_v46 = vadd.f32 1.0, %v2103_v45  ;;  %v2473_v45 = vrot.slane %v1278_v39, %v2439_v27 }
0x11e4   :  { %2104 = vrcp.f32 %v1452_v46  ;;  %v2477_v46 = vrot.slane %v626_v41, %v2439_v27 }
0x11e6   :  { %v635_v33 = vunpack.i.h.s16 %v2477_v46 }
0x11ee   :  { %v2105_v47 = vpop.eup %2104 }
0x11ef   :  { %v1461_v51 = vmul.f32 %v2105_v47, %v1459_v50 }
0x1252   :  { %v1464_v48 = vpop.permute.xlu0 %1463 }
0x1253   :  { %v1466_v49 = vmul.f32 %v2105_v47, %v1464_v48 }
0x1255   :  { %1468 = vrot.lane.b32.xlu0 %v1466_v49, %s2195_s29  ;;  %v1812_v49 = vpack.i.b16 %v2473_v45, %v2473_v45 }
0x12c7   :  { %v1469_v53 = vpop.permute.xlu0 %1468 }
0x12c8   :  { %v1471_v54 = vadd.f32 %v1469_v53, %v1461_v51  ;;  %v1785_v53 = vpack.i.b16 %v2477_v46, %v2477_v46 }
0x12ca   :  { %2106 = vtanh.f32 %v1471_v54 }
0x12d4   :  { %v2107_v55 = vpop.eup %2106 }
0x12d5   :  { %1474 = vrot.lane.b32.xlu1 %v2107_v55, %s2195_s29 }
0x12d9   :  { %1479 = vrot.lane.b32.xlu1 %v1471_v54, %s2196_s3 }
0x1347   :  { %v1475_v61 = vpop.permute.xlu1 %1474 }
0x1348   :  { %v2429_v62 = vmul.f32 %v2105_v47, %v1475_v61  ;;  %v1061_v47 = vrot.slane %v1053_v44, %v2439_v27 }
0x134a   :  { %1484 = vrot.lane.b32.xlu0 %v2429_v62, %s2187_s25  ;;  %v1488_v48 = vpack.c.bf16 %v2429_v62, %v2429_v62  ;;  %v2491_v54 = vrot.slane %v1061_v47, %v2439_v27 }
0x134b   :  { %v1480_v63 = vpop.permute.xlu1 %1479 }
0x134c   :  { %1482 = vst.msk [vmem:[#allocation3] sm:$0x3] %vm59_vm0, %v1480_v63  ;;  %v1496_v50 = vrot.slane %v1488_v48, %v2439_v27  ;;  %v1803_v56 = vpack.i.b16 %v2491_v54, %v2491_v54 }
0x134e   :  { %v2498_v57 = vrot.slane %v1496_v50, %v2439_v27 }
0x1350   :  { %v1821_v59 = vpack.i.b16 %v2498_v57, %v2498_v57 }
0x1353   :  { %v1673_v1 = vld [vmem:[#allocation3] sm:$0x3] }
0x1354   :  { %1675 = vrot.lane.b32.xlu1 %v1673_v1, %s2195_s29 }
0x13bc   :  { %v1485_v2 = vpop.permute.xlu0 %1484 }
0x13bd   :  { %1487 = vst.msk [vmem:[#allocation2] sm:$0x3] %vm59_vm0, %v1485_v2 }
0x13c4   :  { %v1538_v0 = vld [vmem:[#allocation2] sm:$0x3] }
0x13c5   :  { %v1539_v3 = vpack.c.bf16 %v1538_v0, %v1538_v0  ;;  %v443_v0 = vld [vmem:[%s2684_s4] sm:$0x1] }
0x13c6   :  { %v1676_v61 = vpop.permute.xlu1 %1675 }
0x13c7   :  { %1996 = vmatmul.mubr.msk.bf16.vlgmr.msra.gmra.mrb[28].mxu0 %vm85_vm2, %v1539_v3  ;;  %vm2586_vm2 = vmand %vm1310_vm9, %vm1528_vm1 }
0x149a   :  { %v1597_v8 = vpop.f32.mrb[28].mxu0 }
0x149b   :  { %v1653_v11 = vadd.f32 %v1652_v4, %v1597_v8  ;;  %v1997_v12 = vpop.f32.mrb[29].mxu0  ;;  %v417_v8 = vunpack.i.h.s16 %v2450_v35 }
0x149c   :  { %v1600_v13 = vpop.f32.mrb[30].mxu0  ;;  %v1751_v12 = vld [vmem:[%s2684_s4 + $0x4] sm:$0x8] }
0x149d   :  { %v1665_v14 = vadd.f32 %v2289_v10, %v1653_v11  ;;  %v1998_v15 = vpop.f32.mrb[31].mxu0  ;;  %v2198_v10 = vmov 286326784   ;;  %v1313_v13 = vld [vmem:[%s2684_s4] sm:$0x4] }
0x149e   :  { %v421_v29 = vunpack.c.l.s4 %v2198_v10  ;;  %v419_v15 = vpack.i.b16 %v417_v8, %v417_v8  ;;  %v1748_v8 = vld [vmem:[%s2684_s4] sm:$0x8] }
0x149f   :  { %2108 = vtanh.f32 %v1665_v14  ;;  %v1829_v18 = vmul.f32 -1.442695, %v1665_v14 }
0x14a0   :  { %v422_v32 = vunpack.c.0.s8 %v421_v29 }
0x14a1   :  { %2110 = vpow2.f32 %v1829_v18 }
0x14a2   :  { %v2456_v38 = vsub.s32 %v422_v32, %v406_v24 }
0x14a4   :  { %v426_v42 = vrot.slane %v1776_v40, %v2456_v38  ;;  %v861_v52 = vrot.slane %v1794_v43, %v2456_v38  ;;  %v1296_v51 = vrot.slane %v1812_v49, %v2456_v38  ;;  %v644_v55 = vrot.slane %v1785_v53, %v2456_v38 }
0x14a5   :  { %v1079_v58 = vrot.slane %v1803_v56, %v2456_v38  ;;  %v1514_v60 = vrot.slane %v1821_v59, %v2456_v38  ;;  %v433_v23 = vrot.slane %v419_v15, %v2456_v38  ;;  %v1070_v40 = vunpack.i.h.s16 %v2491_v54  ;;  %v881_v54 = vld [vmem:[%s2684_s4 + $0x4] sm:$0x2]  ;;  %v1316_v59 = vld [vmem:[%s2684_s4 + $0x4] sm:$0x4] }
0x14a7   :  { %v1072_v44 = vpack.i.b16 %v1070_v40, %v1070_v40 }
0x14a9   :  { %v2109_v16 = vpop.eup %2108  ;;  %v1086_v43 = vrot.slane %v1072_v44, %v2456_v38 }
0x14aa   :  { %1680 = vrot.lane.b32.xlu0 %v2109_v16, %s2195_s29  ;;  %v852_v16 = vunpack.i.h.s16 %v2463_v26 }
0x14ab   :  { %v2111_v22 = vpop.eup %2110 }
0x14ac   :  { %v1669_v25 = vadd.f32 1.0, %v2111_v22  ;;  %v854_v24 = vpack.i.b16 %v852_v16, %v852_v16 }
0x14ae   :  { %2112 = vrcp.f32 %v1669_v25  ;;  %v1287_v25 = vunpack.i.h.s16 %v2473_v45  ;;  %v868_v31 = vrot.slane %v854_v24, %v2456_v38 }
0x14b0   :  { %v1289_v32 = vpack.i.b16 %v1287_v25, %v1287_v25 }
0x14b2   :  { %v1303_v39 = vrot.slane %v1289_v32, %v2456_v38 }
0x14b8   :  { %v2452_v36 = vpop.eup %2112 }
0x14b9   :  { %v1678_v62 = vmul.f32 %v2452_v36, %v1676_v61 }
0x151c   :  { %v1681_v37 = vpop.permute.xlu0 %1680 }
0x151d   :  { %v1683_v17 = vmul.f32 %v2452_v36, %v1681_v37 }
0x151f   :  { %1685 = vrot.lane.b32.xlu0 %v1683_v17, %s2195_s29  ;;  %v637_v17 = vpack.i.b16 %v635_v33, %v635_v33 }
0x1521   :  { %v651_v41 = vrot.slane %v637_v17, %v2456_v38 }
0x1523   :  { %434 = vrot.lane.b32.xlu0 %v426_v42, %s2187_s25  ;;  %v1505_v42 = vunpack.i.h.s16 %v2498_v57 }
0x1525   :  { %v1507_v45 = vpack.i.b16 %v1505_v42, %v1505_v42 }
0x1527   :  { %869 = vrot.lane.b32.xlu0 %v861_v52, %s2187_s25  ;;  %v1521_v46 = vrot.slane %v1507_v45, %v2456_v38  ;;  %v446_v52 = vld [vmem:[%s2684_s4 + $0x4] sm:$0x1] }
0x152b   :  { %1304 = vrot.lane.b32.xlu0 %v1296_v51, %s2187_s25 }
0x152f   :  { %652 = vrot.lane.b32.xlu0 %v644_v55, %s2187_s25 }
0x1533   :  { %1087 = vrot.lane.b32.xlu0 %v1079_v58, %s2187_s25 }
0x1537   :  { %1522 = vrot.lane.b32.xlu0 %v1514_v60, %s2187_s25 }
0x1591   :  { %v1686_v63 = vpop.permute.xlu0 %1685 }
0x1592   :  { %v2508_v1 = vadd.f32 %v1686_v63, %v1678_v62 }
0x1594   :  { %2114 = vtanh.f32 %v2508_v1 }
0x1595   :  { %v435_v3 = vpop.permute.xlu0 %434 }
0x1596   :  { %v444_v4 = vsel %vm2511_vm5, %v435_v3, %v443_v0 }
0x1597   :  { %445 = vst [vmem:[%s2684_s4] sm:$0x1] %v444_v4 }
0x1599   :  { %v870_v7 = vpop.permute.xlu0 %869 }
0x159a   :  { %v879_v11 = vsel %vm2525_vm8, %v870_v7, %v878_v6 }
0x159b   :  { %880 = vst [vmem:[%s2684_s4] sm:$0x2] %v879_v11 }
0x159d   :  { %v1305_v14 = vpop.permute.xlu0 %1304 }
0x159e   :  { %v2115_v18 = vpop.eup %2114  ;;  %v1314_v19 = vsel %vm2539_vm11, %v1305_v14, %v1313_v13  ;;  %v660_v21 = vld [vmem:[%s2684_s4] sm:$0x1] }
0x159f   :  { %1315 = vst [vmem:[%s2684_s4] sm:$0x4] %v1314_v19  ;;  %1691 = vrot.lane.b32.xlu1 %v2115_v18, %s2195_s29 }
0x15a1   :  { %v653_v22 = vpop.permute.xlu0 %652 }
0x15a2   :  { %v661_v28 = vsel %vm2554_vm13, %v653_v22, %v660_v21  ;;  %v1095_v29 = vld [vmem:[%s2684_s4] sm:$0x2] }
0x15a3   :  { %662 = vst [vmem:[%s2684_s4] sm:$0x1] %v661_v28  ;;  %436 = vrot.lane.b32.xlu1 %v433_v23, %s2187_s25 }
0x15a5   :  { %v1088_v30 = vpop.permute.xlu0 %1087 }
0x15a6   :  { %v1096_v34 = vsel %vm2570_vm15, %v1088_v30, %v1095_v29  ;;  %v1530_v9 = vld [vmem:[%s2684_s4] sm:$0x4] }
0x15a7   :  { %1097 = vst [vmem:[%s2684_s4] sm:$0x2] %v1096_v34  ;;  %871 = vrot.lane.b32.xlu1 %v868_v31, %s2187_s25 }
0x15a9   :  { %v1523_v37 = vpop.permute.xlu0 %1522 }
0x15aa   :  { %v1531_v26 = vsel %vm2586_vm2, %v1523_v37, %v1530_v9 }
0x15ab   :  { %1532 = vst [vmem:[%s2684_s4] sm:$0x4] %v1531_v26  ;;  %1306 = vrot.lane.b32.xlu1 %v1303_v39, %s2187_s25 }
0x15af   :  { %654 = vrot.lane.b32.xlu1 %v651_v41, %s2187_s25 }
0x15b3   :  { %1089 = vrot.lane.b32.xlu1 %v1086_v43, %s2187_s25 }
0x15b7   :  { %1524 = vrot.lane.b32.xlu1 %v1521_v46, %s2187_s25 }
0x1611   :  { %v1692_v47 = vpop.permute.xlu1 %1691 }
0x1612   :  { %v1694_v48 = vmul.f32 %v2452_v36, %v1692_v47 }
0x1614   :  { %v1705_v49 = vpack.c.bf16 %v1694_v48, %v1694_v48 }
0x1615   :  { %v437_v50 = vpop.permute.xlu1 %436 }
0x1616   :  { %v1713_v51 = vrot.slane %v1705_v49, %v2439_v27  ;;  %v447_v53 = vsel %vm2511_vm5, %v437_v50, %v446_v52  ;;  %vm1747_vm5 = vmand %vm1745_vm3, %vm1746_vm4 }
0x1617   :  { %448 = vst [vmem:[%s2684_s4 + $0x4] sm:$0x1] %v447_v53 }
0x1618   :  { %v1720_v36 = vrot.slane %v1713_v51, %v2439_v27 }
0x1619   :  { %v872_v55 = vpop.permute.xlu1 %871 }
0x161a   :  { %v882_v56 = vsel %vm2525_vm8, %v872_v55, %v881_v54  ;;  %v1830_v57 = vpack.i.b16 %v1720_v36, %v1720_v36  ;;  %v1722_v58 = vunpack.i.h.s16 %v1720_v36 }
0x161b   :  { %883 = vst [vmem:[%s2684_s4 + $0x4] sm:$0x2] %v882_v56 }
0x161c   :  { %v1731_v60 = vrot.slane %v1830_v57, %v2456_v38  ;;  %v1724_v61 = vpack.i.b16 %v1722_v58, %v1722_v58 }
0x161d   :  { %v1307_v62 = vpop.permute.xlu1 %1306 }
0x161e   :  { %v1317_v27 = vsel %vm2539_vm11, %v1307_v62, %v1316_v59  ;;  %1739 = vrot.lane.b32.xlu0 %v1731_v60, %s2187_s25  ;;  %v1738_v63 = vrot.slane %v1724_v61, %v2456_v38  ;;  %v663_v2 = vld [vmem:[%s2684_s4 + $0x4] sm:$0x1] }
0x161f   :  { %1318 = vst [vmem:[%s2684_s4 + $0x4] sm:$0x4] %v1317_v27 }
0x1620   :  { %1741 = vrot.lane.b32.xlu1 %v1738_v63, %s2187_s25 }
0x1621   :  { %v655_v0 = vpop.permute.xlu1 %654 }
0x1622   :  { %v664_v3 = vsel %vm2554_vm13, %v655_v0, %v663_v2  ;;  %1696 = vrot.lane.b32.xlu0 %v2508_v1, %s2196_s3  ;;  %v1098_v38 = vld [vmem:[%s2684_s4 + $0x4] sm:$0x2] }
0x1623   :  { %665 = vst [vmem:[%s2684_s4 + $0x4] sm:$0x1] %v664_v3 }
0x1624   :  { %1701 = vrot.lane.b32.xlu1 %v1694_v48, %s2187_s25 }
0x1625   :  { %v1090_v4 = vpop.permute.xlu1 %1089 }
0x1626   :  { %v1099_v5 = vsel %vm2570_vm15, %v1090_v4, %v1098_v38  ;;  %v1533_v1 = vld [vmem:[%s2684_s4 + $0x4] sm:$0x4] }
0x1627   :  { %1100 = vst [vmem:[%s2684_s4 + $0x4] sm:$0x2] %v1099_v5 }
0x1629   :  { %v1525_v6 = vpop.permute.xlu1 %1524 }
0x162a   :  { %v1534_v7 = vsel %vm2586_vm2, %v1525_v6, %v1533_v1 }
0x162b   :  { %1535 = vst [vmem:[%s2684_s4 + $0x4] sm:$0x4] %v1534_v7 }
0x1690   :  { %v1740_v11 = vpop.permute.xlu0 %1739 }
0x1691   :  { %v1749_v13 = vsel %vm1747_vm5, %v1740_v11, %v1748_v8 }
0x1692   :  { %1750 = vst [vmem:[%s2684_s4] sm:$0x8] %v1749_v13  ;;  %v1742_v14 = vpop.permute.xlu1 %1741 }
0x1693   :  { %v1752_v15 = vsel %vm1747_vm5, %v1742_v14, %v1751_v12 }
0x1694   :  { %1753 = vst [vmem:[%s2684_s4 + $0x4] sm:$0x8] %v1752_v15  ;;  %v1697_v16 = vpop.permute.xlu0 %1696 }
0x1695   :  { %1699 = vst.msk [vmem:[#allocation3] sm:$0x3] %vm59_vm0, %v1697_v16 }
0x1696   :  { %v1702_v18 = vpop.permute.xlu1 %1701 }
0x1697   :  { %1704 = vst.msk [vmem:[#allocation2] sm:$0x3] %vm59_vm0, %v1702_v18 }
0x1698   :  { %1758 = vsyncpa [#allocation5], 1 }
0x1699   :  { %1759 = vsyncpa [#allocation7], 1 }

</bundles_post_ra>
